<compile_context>
chip_gen: v7x
topology: tpu7x:2x2x1
jax: 0.10.0
libtpu: 0.0.40
codegen_flags: <defaults>
</compile_context>

<pallas_src>
import functools

import jax
import jax.numpy as jnp
from jax.experimental import pallas as pl
from jax.experimental.pallas import tpu as pltpu


# ----------------------------------------------------------------------------
# Kernel: H = -K (exact FD collapse for the linear force field) + ridge on diag
# ----------------------------------------------------------------------------
def _hessian_ridge_kernel(n_valid, k_ref, hreg_ref):
    K = k_ref[...]                       # (npad, npad) f32, zero-padded beyond n_valid
    npad = K.shape[0]

    # Boolean diagonal mask (no float identity materialized).
    rows = jax.lax.broadcasted_iota(jnp.int32, (npad, npad), 0)
    cols = jax.lax.broadcasted_iota(jnp.int32, (npad, npad), 1)
    diag_mask = rows == cols

    # Central-difference force Jacobian, torch convention H[:,j] = (f+ - f-)/(2*eps).
    # For f(d) = f_base - K @ d the base-force terms cancel and the difference
    # quotient is exact: H = -K.  (No MXU pass, no eps round-trip.)
    H = -K

    # Ridge: 0.1 * mean(|diag(H)|) added on the diagonal.  Padding rows/cols of K are
    # zero, so summing the full (masked) diagonal and dividing by the true n is exact.
    diag_abs_mean = jnp.sum(jnp.where(diag_mask, jnp.abs(H), 0.0)) * (1.0 / n_valid)
    hreg_ref[...] = jnp.where(diag_mask, H + 0.1 * diag_abs_mean, H)


# ----------------------------------------------------------------------------
# Wrapper: size-gated Pallas path with lane-dense (128-padded) output
# ----------------------------------------------------------------------------
def hessian_ridge(K, eps=1e-3, force_pallas=False):
    """Return H_reg = H + 0.1*mean(|diag(H)|)*I with H the FD force Jacobian (= -K here).

    `eps` is kept for interface fidelity with compute_fd_hessian; the central
    difference is exact for the linear synthetic force field, so it drops out.
    """
    del eps
    n = K.shape[0]
    K = K.astype(jnp.float32)

    if n < 512 and not force_pallas:
        # Tiny systems: pallas_call is pure launch/DMA overhead and a fusion barrier;
        # let XLA fuse H_reg construction with the solve prologue.
        H = -K
        ridge = 0.1 * jnp.mean(jnp.abs(jnp.diagonal(H)))
        return H + ridge * jnp.eye(n, dtype=jnp.float32)

    # Lane-dense output: pad to a multiple of 128 (covers the sublane /8 rule too).
    npad = ((n + 127) // 128) * 128
    K_pad = jnp.pad(K, ((0, npad - n), (0, npad - n)))

    kernel = functools.partial(_hessian_ridge_kernel, n)
    h_reg_pad = pl.pallas_call(
        kernel,
        out_shape=jax.ShapeDtypeStruct((npad, npad), jnp.float32),
        in_specs=[pl.BlockSpec(memory_space=pltpu.MemorySpace.VMEM)],
        out_specs=pl.BlockSpec(memory_space=pltpu.MemorySpace.VMEM),
        # O(n^2) VPU work (negate, abs, masked add); one n^2 read + one n^2 write.
        cost_estimate=pl.CostEstimate(
            flops=4 * npad * npad,
            transcendentals=0,
            bytes_accessed=8 * npad * npad,
        ),
    )(K_pad)
    return h_reg_pad[:n, :n]


# ----------------------------------------------------------------------------
# Forward pass (mirrors MatGLLoss.forward)
# ----------------------------------------------------------------------------
@functools.partial(jax.jit, static_argnames=("eps", "force_pallas"))
def matgl_loss_forward(input_pred, K, f_base, eps=1e-3, force_pallas=False):
    # disp0 = zeros_like(input): f0 = f(0) = f_base for the synthetic field.
    h_reg = hessian_ridge(K, eps=eps, force_pallas=force_pallas)

    # -f0 computed here so XLA fuses the negate into the solve epilogue.
    neg_f0 = -f_base.astype(jnp.float32)

    # TODO(synk): torch.linalg.solve + lstsq fallback on singular H_reg has no clean
    # Pallas equivalent; the dense solve stays in XLA.
    delta_x = jnp.linalg.solve(h_reg, neg_f0)
    actual_disp = delta_x.reshape(input_pred.shape)       # view_as(input)

    # No host sync: print from inside the jitted program.
    jax.debug.print("Step norm: {x}", x=jnp.linalg.norm(actual_disp))

    # classifier = MSELoss, left to XLA (a separate pallas_call at 3N=24 elements is
    # pure launch overhead).
    return jnp.mean((input_pred - actual_disp) ** 2)


if __name__ == "__main__":
    N_ATOMS = 8
    n = 3 * N_ATOMS                                       # 3N = 24 degrees of freedom

    key = jax.random.PRNGKey(0)
    k_a, k_f, k_x = jax.random.split(key, 3)

    # Deterministic synthetic harmonic potential parameters (stand-in for MatGL PES).
    A = jax.random.normal(k_a, (n, n), dtype=jnp.float32)
    K = A @ A.T / n + jnp.eye(n, dtype=jnp.float32)       # symmetric positive-definite
    f_base = jax.random.normal(k_f, (n,), dtype=jnp.float32)

    # Predicted displacement vector (shape 3N,), as in the module's `input`.
    input_pred = 0.01 * jax.random.normal(k_x, (n,), dtype=jnp.float32)

    # force_pallas=True so the Pallas kernel path is exercised even at this tiny size.
    loss = matgl_loss_forward(input_pred, K, f_base, eps=1e-3, force_pallas=True)
    jax.block_until_ready(loss)

    # Cross-check against the pure-XLA gate path (same semantics, no Pallas).
    loss_ref = matgl_loss_forward(input_pred, K, f_base, eps=1e-3, force_pallas=False)
    jax.block_until_ready(loss_ref)
    assert jnp.allclose(loss, loss_ref, rtol=1e-5, atol=1e-6), (loss, loss_ref)

    print("KERNEL_OK")
</pallas_src>

<mosaic_0001>
module attributes {stable_mosaic.version = 11 : i64} {
  func.func @_hessian_ridge_kernel(%arg0: memref<128x128xf32, #tpu.memory_space<vmem>>, %arg1: memref<128x128xf32, #tpu.memory_space<vmem>>) attributes {dimension_semantics = [], scalar_prefetch = 0 : i64, scratch_operands = 0 : i64, tpu.core_type = #tpu.core_type<tc>} {
    %c0 = arith.constant 0 : index
    %c0_0 = arith.constant 0 : index
    %0 = vector.load %arg0[%c0, %c0_0] : memref<128x128xf32, #tpu.memory_space<vmem>>, vector<128x128xf32>
    %1 = tpu.iota {dimensions = array<i32: 0>} : vector<128x128xi32>
    %2 = tpu.iota {dimensions = array<i32: 1>} : vector<128x128xi32>
    %3 = arith.cmpi eq, %1, %2 : vector<128x128xi32>
    %cst = arith.constant 0.000000e+00 : f32
    %4 = vector.broadcast %cst : f32 to vector<128x128xf32>
    %5 = arith.subf %4, %0 : vector<128x128xf32>
    %6 = math.absf %5 : vector<128x128xf32>
    %cst_1 = arith.constant 0.000000e+00 : f32
    %7 = vector.broadcast %cst_1 : f32 to vector<128x128xf32>
    %8 = arith.select %3, %6, %7 : vector<128x128xi1>, vector<128x128xf32>
    %9 = vector.shape_cast %8 : vector<128x128xf32> to vector<1x128x128xf32>
    %cst_2 = arith.constant dense<0.000000e+00> : vector<1xf32>
    %10 = vector.multi_reduction <add>, %9, %cst_2 [1, 2] : vector<1x128x128xf32> to vector<1xf32>
    %11 = vector.shape_cast %10 : vector<1xf32> to vector<1x1x1xf32>
    %12 = vector.extract %11[0, 0, 0] : f32 from vector<1x1x1xf32>
    %cst_3 = arith.constant 0.0416666679 : f32
    %13 = arith.mulf %12, %cst_3 : f32
    %cst_4 = arith.constant 1.000000e-01 : f32
    %14 = arith.mulf %cst_4, %13 : f32
    %15 = vector.broadcast %14 : f32 to vector<128x128xf32>
    %16 = arith.addf %5, %15 : vector<128x128xf32>
    %17 = arith.select %3, %16, %5 : vector<128x128xi1>, vector<128x128xf32>
    %c0_5 = arith.constant 0 : index
    %c0_6 = arith.constant 0 : index
    %18 = vector.load %arg1[%c0_5, %c0_6] : memref<128x128xf32, #tpu.memory_space<vmem>>, vector<128x128xf32>
    tpu.vector_store %arg1[%c0_5, %c0_6], %17 {strides = array<i32>} : memref<128x128xf32, #tpu.memory_space<vmem>>, vector<128x128xf32>,
    return
  }
}

</mosaic_0001>

<bundles_post_ra>
// kernel: custom-call.8
= control target key start
LH: loop header
LB: loop body
LE: loop exit
PB: predicated region body
PF: predicated region fallthrough
CT: control target
= control target key end

     0   :  { %5 = vsyncpa [#allocation4], 0  ;;  %s929_s0 = inlined_call_operand.vmem [shape: f32[24,24], index: 0, kind: input, shape index: {}]   ;;  %s930_s1 = inlined_call_operand.vmem [shape: f32[24,24], index: 1, kind: output, shape index: {0}]   ;;  %s931_s2 = inlined_call_operand.hbm [shape: s32[24], index: 2, kind: output, shape index: {1}]   ;;  %s932_s3 = inlined_call_operand.vmem [shape: s32[24], index: 3, kind: output, shape index: {2}]  }
   0x1   :  { %s19_s14 = scalar_lea.vmem %s929_s0, 16 }
   0x2   :  { %p486_p0 = scmp.gt.s32.totalorder %s929_s0, %s19_s14 }
   0x3   :  { %s781_s17 = smov (!%p486_p0), [#allocation0]   ;;  %s785_s20 = smov (!%p486_p0), %s929_s0  }
   0x4   :  { %487 = sbr.rel (%p486_p0) target bundleno = 21 (0x15), region = 161 }
   0xb LB: > { %v53_v0 = vld [vmem:[%s787_s20] sm:$0xff]  ;;  %s55_s20 = scalar_lea.vmem %s787_s20, 8   ;;  %s787_s20 = sphi %s785_s20, %s55_s20   ;;  %s783_s17 = sphi %s781_s17, %s56_s17  }
   0xc   : > { %54 = vst [vmem:[%s783_s17] sm:$0xff] %v53_v0  ;;  %s56_s17 = scalar_lea.vmem %s783_s17, 8   ;;  %p50_p1 = scmp.gt.s32.totalorder %s55_s20, %s19_s14 }
   0xe   :  { %52 = sbr.rel (!%p50_p1) target bundleno = 11 (0xb), region = 167 }
  0x15 PF:  { %v68_v1 = vld [vmem:[#allocation0] sm:$0xff]  ;;  %v72_v2 = vld [vmem:[#allocation0 + $0x8] sm:$0xff]  ;;  %v76_v3 = vld [vmem:[#allocation0 + $0x10] sm:$0xff]  ;;  %v79_v4 = vlaneseq  ;;  %v805_v5 = vmov 0   ;;  %s789_s0 = smov 0  }
  0x16   :  { %69 = vst [vmem:[#allocation1] sm:$0xff] %v68_v1  ;;  %73 = vst [vmem:[#allocation1 + $0x8] sm:$0xff] %v72_v2 }
  0x17   :  { %77 = vst [vmem:[#allocation1 + $0x10] sm:$0xff] %v76_v3  ;;  %78 = vst [vmem:[#allocation2] sm:$0x1] %v805_v5  ;;  %v837_v6 = vshrl.u32 %v79_v4, 7 }
  0x18 LB: > { %s544_s21 = sshll.u32 %s791_s0, 3  ;;  %s87_s0 = sadd.s32 1, %s791_s0   ;;  %s791_s0 = sphi %s789_s0, %s87_s0  }
  0x19   : > { %v91_v7 = vstv %s544_s21  ;;  %s89_s22 = scalar_lea.vmem [#allocation7], %s544_s21  ;;  %p84_p2 = scmp.ge.s32.totalorder %s87_s0, 3  }
  0x1a   : > { %v92_v8 = vadd.s32 %v91_v7, %v837_v6  ;;  %s840_s23 = smov (%p84_p2), 0  }
  0x1b   :  { %86 = sbr.rel (!%p84_p2) target bundleno = 24 (0x18), region = 178 }
  0x1c   : > { %93 = vst [vmem:[%s89_s22] sm:$0xff] %v92_v8 }
  0x22 LB: > { %v104_v9 = vld [vmem:[#allocation1] sm:$0xff]  ;;  %v116_v10 = vld [vmem:[#allocation1 + $0x8] sm:$0xff]  ;;  %v846_v11 = vadd.s32 8, %v837_v6  ;;  %v849_v13 = vstv %s795_s23  ;;  %v128_v15 = vld [vmem:[#allocation1 + $0x10] sm:$0xff]  ;;  %v854_v16 = vadd.s32 16, %v837_v6  ;;  %s174_s24 = ssub.s32 128, %s795_s23  ;;  %s795_s23 = sphi %s840_s23, %s99_s23  }
  0x23   : > { %v105_v12 = vand.u32 2147483647, %v104_v9  ;;  %v117_v14 = vand.u32 2147483647, %v116_v10  ;;  %vm108_vm0 = vcmp.ge.s32.totalorder %v837_v6, %v849_v13  ;;  %v129_v19 = vand.u32 2147483647, %v128_v15 }
  0x24   : > { %vm120_vm3 = vcmp.ge.s32.totalorder %v846_v11, %v849_v13  ;;  %vm132_vm6 = vcmp.ge.s32.totalorder %v854_v16, %v849_v13  ;;  %v180_v52 = vand.u32 127, %v79_v4  ;;  %v183_v54 = vld [vmem:[#allocation2] ss:$0 sm:$0xff]  ;;  %s186_s25 = scalar_lea.vmem [#allocation1], %s795_s23  ;;  %s192_s27 = scalar_lea.vmem [#allocation7], %s795_s23 }
  0x25   : > { %vm546_vm1 = vcmp.gt.f32.partialorder %v105_v12, -inf  ;;  %v188_v55 = vld [vmem:[%s186_s25] ss:$0 sm:$0xff]  ;;  %s99_s23 = sadd.s32 1, %s795_s23  }
  0x26   : > { %vm112_vm2 = vmand %vm108_vm0, %vm546_vm1  ;;  %vm867_vm0 = vcmp.eq.s32.totalorder %v180_v52, %v849_v13  ;;  %v194_v56 = vld [vmem:[%s192_s27] ss:$0 sm:$0xff]  ;;  %p96_p3 = scmp.ge.s32.totalorder %s99_s23, 24  }
  0x27   : > { %v113_v17 = vsel %vm112_vm2, %v837_v6, %v849_v13  ;;  %v114_v18 = vsel %vm112_vm2, %v105_v12, -inf  ;;  %vm227_vm2 = vcmp.gt.s32.totalorder %v846_v11, %v849_v13  ;;  %s797_s5 = smov (%p96_p3), %s930_s1   ;;  %s801_s6 = smov (%p96_p3), [#allocation1]  }
  0x28   : > { %vm123_vm4 = vcmp.lt.f32.partialorder %v114_v18, %v117_v14 }
  0x29   : > { %vm124_vm5 = vmand %vm120_vm3, %vm123_vm4  ;;  %vm212_vm3 = vcmp.gt.s32.totalorder %v837_v6, %v849_v13  ;;  %vm242_vm4 = vcmp.gt.s32.totalorder %v854_v16, %v849_v13 }
  0x2a   : > { %v125_v20 = vsel %vm124_vm5, %v846_v11, %v113_v17  ;;  %v126_v21 = vsel %vm124_vm5, %v117_v14, %v114_v18 }
  0x2b   : > { %vm135_vm7 = vcmp.lt.f32.partialorder %v126_v21, %v129_v19 }
  0x2c   : > { %vm136_vm8 = vmand %vm132_vm6, %vm135_vm7 }
  0x2d   : > { %v137_v22 = vsel %vm136_vm8, %v854_v16, %v125_v20  ;;  %v138_v23 = vsel %vm136_vm8, %v129_v19, %v126_v21  ;;  %vm231_vm6 = vmand %vm227_vm2, %vm867_vm0 }
  0x2e   : > { %v139_v24 = vrot.slane %v138_v23, 1  ;;  %v140_v25 = vrot.slane %v137_v22, 1  ;;  %vm216_vm7 = vmand %vm212_vm3, %vm867_vm0 }
  0x2f   : > { %vm246_vm8 = vmand %vm242_vm4, %vm867_vm0 }
  0x30   : > { %vm141_vm9 = vcmp.ge.f32.partialorder %v139_v24, %v138_v23  ;;  %v144_v26 = vrot.slane %v139_v24, 1  ;;  %v145_v27 = vrot.slane %v140_v25, 1 }
  0x31   : > { %v142_v28 = vsel %vm141_vm9, %v139_v24, %v138_v23  ;;  %v143_v29 = vsel %vm141_vm9, %v140_v25, %v137_v22  ;;  %vm204_vm9 = vcmp.gt.s32.totalorder %v180_v52, %v849_v13 }
  0x32   : > { %vm146_vm10 = vcmp.ge.f32.partialorder %v144_v26, %v142_v28  ;;  %v149_v30 = vrot.slane %v144_v26, 1  ;;  %v150_v31 = vrot.slane %v145_v27, 1 }
  0x33   : > { %v147_v32 = vsel %vm146_vm10, %v144_v26, %v142_v28  ;;  %v148_v33 = vsel %vm146_vm10, %v145_v27, %v143_v29 }
  0x34   : > { %vm151_vm11 = vcmp.ge.f32.partialorder %v149_v30, %v147_v32  ;;  %v154_v34 = vrot.slane %v149_v30, 1  ;;  %v155_v35 = vrot.slane %v150_v31, 1 }
  0x35   : > { %v152_v36 = vsel %vm151_vm11, %v149_v30, %v147_v32  ;;  %v153_v37 = vsel %vm151_vm11, %v150_v31, %v148_v33 }
  0x36   : > { %vm156_vm12 = vcmp.ge.f32.partialorder %v154_v34, %v152_v36  ;;  %v159_v38 = vrot.slane %v154_v34, 1  ;;  %v160_v39 = vrot.slane %v155_v35, 1 }
  0x37   : > { %v157_v40 = vsel %vm156_vm12, %v154_v34, %v152_v36  ;;  %v158_v41 = vsel %vm156_vm12, %v155_v35, %v153_v37 }
  0x38   : > { %vm161_vm13 = vcmp.ge.f32.partialorder %v159_v38, %v157_v40  ;;  %v164_v42 = vrot.slane %v159_v38, 1  ;;  %v165_v43 = vrot.slane %v160_v39, 1 }
  0x39   : > { %v162_v44 = vsel %vm161_vm13, %v159_v38, %v157_v40  ;;  %v163_v45 = vsel %vm161_vm13, %v160_v39, %v158_v41 }
  0x3a   : > { %vm166_vm14 = vcmp.ge.f32.partialorder %v164_v42, %v162_v44  ;;  %v169_v46 = vrot.slane %v164_v42, 1  ;;  %v170_v47 = vrot.slane %v165_v43, 1 }
  0x3b   : > { %v167_v48 = vsel %vm166_vm14, %v164_v42, %v162_v44  ;;  %v168_v49 = vsel %vm166_vm14, %v165_v43, %v163_v45 }
  0x3c   : > { %vm171_vm15 = vcmp.ge.f32.partialorder %v169_v46, %v167_v48 }
  0x3d   : > { %v173_v50 = vsel %vm171_vm15, %v170_v47, %v168_v49 }
  0x3e   : > { %175 = vrot.lane.b32.xlu0 %v173_v50, %s174_s24 }
  0xb0   : > { %v176_v51 = vpop.permute.xlu0 %175 }
  0xb1   : > { %554 = vpush %v176_v51 }
  0xe2   : > { %s555_s26 = spop %554 }
  0xe3   : > { %v182_v57 = vstv %s555_s26  ;;  %s187_s28 = scalar_lea.vmem [#allocation1], %s555_s26  ;;  %s193_s29 = scalar_lea.vmem [#allocation7], %s555_s26 }
  0xe4   : > { %v184_v58 = vsel %vm867_vm0, %v182_v57, %v183_v54  ;;  %v189_v59 = vld [vmem:[%s187_s28] ss:$0 sm:$0xff] }
  0xe5   : > { %v195_v60 = vld [vmem:[%s193_s29] ss:$0 sm:$0xff]  ;;  %185 = vst [vmem:[#allocation2] sm:$0x1] %v184_v58  ;;  %190 = vst [vmem:[%s187_s28] sm:$0x1] %v188_v55  ;;  %vm198_vm1 = vcmp.ne.f32.partialorder %v189_v59, 0.0 }
  0xe6   : > { %196 = vst [vmem:[%s193_s29] sm:$0x1] %v194_v56  ;;  %191 = vst [vmem:[%s186_s25] sm:$0x1] %v189_v59  ;;  %v205_v17 = vsel %vm204_vm9, %v189_v59, 0.0 }
  0xe7   : > { %197 = vst [vmem:[%s192_s27] sm:$0x1] %v195_v60  ;;  %vm199_vm5 = vmand %vm867_vm0, %vm198_vm1 }
  0xe8   : > { %v200_v61 = vsel %vm199_vm5, %v189_v59, 1.0 }
  0xe9   : > { %v228_v62 = vsel %vm227_vm2, %v200_v61, 1.0  ;;  %v213_v63 = vsel %vm212_vm3, %v200_v61, 1.0  ;;  %v243_v0 = vsel %vm242_vm4, %v200_v61, 1.0 }
  0xea   : > { %687 = vrcp.f32 %v228_v62 }
  0xeb   : > { %689 = vrcp.f32 %v213_v63 }
  0xec   : > { %691 = vrcp.f32 %v243_v0  ;;  %v307_v28 = vld [vmem:[#allocation2] sm:$0x1] (%p96_p3) }
  0xed   : > { %v224_v2 = vld [vmem:[#allocation1 + $0x8] sm:$0xff]  ;;  %v209_v7 = vld [vmem:[#allocation1] sm:$0xff]  ;;  %v239_v10 = vld [vmem:[#allocation1 + $0x10] sm:$0xff]  ;;  %309 = vst [vmem:[#allocation3] sm:$0x1] (%p96_p3), %v307_v28 }
  0xee   :  { %v253_v13 = vld [vmem:[#allocation7] sm:$0xff] (%p96_p3)  ;;  %v255_v16 = vld [vmem:[#allocation7 + $0x8] sm:$0xff] (%p96_p3)  ;;  %v257_v27 = vld [vmem:[#allocation7 + $0x10] sm:$0xff] (%p96_p3) }
  0xf4   : > { %v688_v1 = vpop.eup %687 }
  0xf5   : > { %v690_v3 = vpop.eup %689  ;;  %v230_v5 = vmul.f32 %v688_v1, %v224_v2 }
  0xf6   : > { %v692_v8 = vpop.eup %691  ;;  %v215_v9 = vmul.f32 %v690_v3, %v209_v7 }
  0xf7   : > { %v232_v12 = vsel %vm231_vm6, %v230_v5, 0.0  ;;  %v245_v14 = vmul.f32 %v692_v8, %v239_v10 }
  0xf8   : > { %233 = vadd.xlane.f32.xlu1 %v232_v12  ;;  %v217_v15 = vsel %vm216_vm7, %v215_v9, 0.0 }
  0xf9   : > { %218 = vadd.xlane.f32.xlu0 %v217_v15  ;;  %v247_v11 = vsel %vm246_vm8, %v245_v14, 0.0 }
  0xfc   : > { %248 = vadd.xlane.f32.xlu1 %v247_v11 }
 0x126   :  { %271 = vxpose.xlu0.b32.start [1/3] (short) (narrow) (%p96_p3), %v253_v13, 8 }
 0x12a   :  { %272 = vxpose.xlu0.b32.cont [2/3] (short) (narrow) (%p96_p3), %v255_v16, 8 }
 0x12e   :  { %273 = vxpose.xlu0.b32.end [3/3] (short) (narrow) (%p96_p3), %v257_v27, 8 }
 0x185   : > { %v234_v18 = vpop.xlane.xlu1 %233 }
 0x186   : > { %v235_v19 = vmul.f32 %v234_v18, %v205_v17  ;;  %v219_v20 = vpop.xlane.xlu0 %218 }
 0x187   : > { %v220_v21 = vmul.f32 %v219_v20, %v205_v17 }
 0x188   : > { %v236_v22 = vsub.f32 %v230_v5, %v235_v19  ;;  %98 = sbr.rel (!%p96_p3) target bundleno = 34 (0x22), region = 189 }
 0x189   : > { %v221_v23 = vsub.f32 %v215_v9, %v220_v21  ;;  %v249_v24 = vpop.xlane.xlu1 %248 }
 0x18a   : > { %237 = vst [vmem:[#allocation1 + $0x8] sm:$0xff] %v236_v22  ;;  %v250_v25 = vmul.f32 %v249_v24, %v205_v17 }
 0x18b   : > { %222 = vst [vmem:[#allocation1] sm:$0xff] %v221_v23 }
 0x18c   : > { %v251_v26 = vsub.f32 %v245_v14, %v250_v25 }
 0x18e   : > { %252 = vst [vmem:[#allocation1 + $0x10] sm:$0xff] %v251_v26 }
 0x1a6   :  { %v287_v29 = vpop.trf.xlu0 }
 0x1a7   :  { %303 = vst [vmem:[#allocation5] sm:$0x1] %v287_v29 }
 0x1ae   :  { %v313_v30 = vld [vmem:[#allocation5] sm:$0x1] }
 0x1af   :  { %315 = vst [vmem:[#allocation6] sm:$0x1] %v313_v30 }
 0x1b0 LB: > { %v363_v4 = vld [vmem:[%s803_s6] sm:$0xff]  ;;  %s365_s6 = scalar_lea.vmem %s803_s6, 8   ;;  %s803_s6 = sphi %s801_s6, %s365_s6   ;;  %s799_s5 = sphi %s797_s5, %s366_s5  }
 0x1b1   : > { %364 = vst [vmem:[%s799_s5] sm:$0xff] %v363_v4  ;;  %s366_s5 = scalar_lea.vmem %s799_s5, 8   ;;  %p360_p4 = scmp.gt.s32.totalorder %s365_s6, [#allocation1 + $0x10] }
 0x1b2   :  { %s806_s7 = smov (%p360_p4), [#allocation3]  }
 0x1b3   :  { %362 = sbr.rel (!%p360_p4) target bundleno = 432 (0x1b0), region = 211  ;;  %s383_s8 = sshll.u32 (%p360_p4), %s806_s7, 4  ;;  %s384_s8 = int_to_ptr.vmem [resolvable:$true] %s383_s8 }
 0x1b4   :  { %s693_s1 = scalar_lea.vmem (%p360_p4), %s384_s8, 16  ;;  %s697_s11 = scalar_lea.vmem (%p360_p4), %s384_s8, 32 }
 0x1b5   :  { %p694_p5 = scmp.ne.s32.totalorder (%p360_p4), %s384_s8, %s693_s1  ;;  %p698_p6 = scmp.lt.s32.totalorder (%p360_p4), %s384_s8, %s384_s8 }
 0x1b6   :  { %v449_v6 = vld [vmem:[#allocation6] sm:$0x1] (%p360_p4)  ;;  %p699_p7 = scmp.lt.s32.totalorder (%p360_p4), %s697_s11, %s693_s1 }
 0x1b7   :  { %450 = vst [vmem:[%s932_s3] sm:$0x1] (%p360_p4), %v449_v6 }
 0x1b8   :  { %p700_p8 = por (%p360_p4), %p699_p7, %p698_p6 }
 0x1ba   :  { %p701_p9 = pnand %p700_p8, %p694_p5 }
 0x1bc   :  { %704 = shalt.err (!%p701_p9)
}
 0x1bd   :  { %s705_s14 = scalar_lea.hbm %s931_s2, 16 }
 0x1be   :  { %p706_p10 = scmp.ne.s32.totalorder %s931_s2, %s705_s14  ;;  %p709_p11 = scmp.lt.u32.totalorder %s705_s14, %s931_s2 }
 0x1c0   :  { %p711_p12 = pnand %p709_p11, %p706_p10 }
 0x1c2   :  { %714 = shalt.err (!%p711_p12)
}
 0x1c3   :  { %386 = dma.vmem_to_hbm [thread:$0]  %s384_s8, 16, %s931_s2, [#allocation4]  }
 0x1c4   :  { %779 = dma.done.wait [#allocation4], 16  }
 0x1c5   :  { %780 = vsyncadd [#allocation4], 4294967280 }
 0x1c6   :  { %456 = vsyncpa [#allocation4], 1 }

// kernel: custom-call.10
= control target key start
LH: loop header
LB: loop body
LE: loop exit
PB: predicated region body
PF: predicated region fallthrough
CT: control target
= control target key end

     0   :  { %v42_v0 = vlaneseq  ;;  %v515_v9 = vmov -1.0   ;;  %v516_v53 = vmov 0.0   ;;  %s620_s0 = inlined_call_operand.vmem [shape: f32[1,24,24], index: 0, kind: input, shape index: {}]   ;;  %s621_s1 = inlined_call_operand.vmem [shape: f32[1,24,24], index: 1, kind: output, shape index: {}]  }
   0x1   :  { %v33_v1 = vld [vmem:[%s620_s0] sm:$0xff]  ;;  %v35_v36 = vld [vmem:[%s620_s0 + $0x8] sm:$0xff] }
   0x2   :  { %v530_v2 = vand.u32 127, %v42_v0  ;;  %v532_v3 = vshrl.u32 %v42_v0, 7 }
   0x4   :  { %vm48_vm0 = vcmp.eq.s32.totalorder %v532_v3, %v530_v2  ;;  %vm44_vm1 = vcmp.lt.s32.totalorder %v530_v2, 24  ;;  %vm53_vm2 = vcmp.ge.s32.totalorder %v532_v3, %v530_v2  ;;  %vm99_vm4 = vcmp.eq.s32.totalorder %v530_v2, 0 }
   0x5   :  { %v50_v4 = vsel %vm48_vm0, %v33_v1, 0.0  ;;  %vm54_vm3 = vmand %vm53_vm2, %vm44_vm1  ;;  %vm96_vm5 = vcmp.eq.s32.totalorder %v530_v2, %v532_v3  ;;  %v100_v10 = vsel %vm99_vm4, 1.0, %v515_v9  ;;  %vm121_vm6 = vcmp.eq.s32.totalorder %v530_v2, 1 }
   0x6   :  { %51 = vadd.xlane.f32.xlu0 %v50_v4  ;;  %v55_v6 = vsel %vm54_vm3, %v33_v1, 0.0  ;;  %v101_v11 = vsel %vm96_vm5, %v100_v10, 0.0  ;;  %vm131_vm7 = vcmp.eq.s32.totalorder %v530_v2, 2  ;;  %vm141_vm8 = vcmp.eq.s32.totalorder %v530_v2, 3 }
   0x7   :  { %vm151_vm9 = vcmp.eq.s32.totalorder %v530_v2, 4  ;;  %v63_v31 = vadd.s32 8, %v532_v3  ;;  %vm161_vm11 = vcmp.eq.s32.totalorder %v530_v2, 5  ;;  %vm171_vm14 = vcmp.eq.s32.totalorder %v530_v2, 6 }
   0x8   :  { %vm181_vm0 = vcmp.eq.s32.totalorder %v530_v2, 7  ;;  %vm191_vm2 = vcmp.eq.s32.totalorder %v530_v2, 8  ;;  %vm205_vm3 = vcmp.eq.s32.totalorder %v530_v2, 9  ;;  %vm219_vm4 = vcmp.eq.s32.totalorder %v530_v2, 10 }
   0x9   :  { %vm64_vm10 = vcmp.eq.s32.totalorder %v63_v31, %v530_v2  ;;  %vm69_vm12 = vcmp.ge.s32.totalorder %v63_v31, %v530_v2  ;;  %vm107_vm15 = vcmp.eq.s32.totalorder %v530_v2, %v63_v31  ;;  %vm233_vm5 = vcmp.eq.s32.totalorder %v530_v2, 11 }
   0xa   :  { %v66_v37 = vsel %vm64_vm10, %v35_v36, 0.0  ;;  %vm70_vm13 = vmand %vm69_vm12, %vm44_vm1  ;;  %v108_v54 = vsel %vm107_vm15, -1.0, %v516_v53  ;;  %vm289_vm12 = vcmp.eq.s32.totalorder %v530_v2, 15  ;;  %vm339_vm15 = vcmp.eq.s32.totalorder %v530_v2, 18 }
   0xb   :  { %v71_v44 = vsel %vm70_vm13, %v35_v36, 0.0 }
  0x93   :  { %v536_v5 = vpop.xlane.xlu0 %51 }
  0x94   :  { %509 = vrcp.f32 %v536_v5 }
  0x9e   :  { %v544_v7 = vpop.eup %509 }
  0x9f   :  { %v57_v8 = vmul.f32 %v544_v7, %v55_v6 }
  0xa1   :  { %58 = vst [vmem:[#allocation2] sm:$0xff] %v57_v8 }
  0xa8   :  { %v117_v12 = vld [vmem:[#allocation2 + $0x1] ss:$0 sm:$0xff]  ;;  %v127_v15 = vld [vmem:[#allocation2 + $0x2] ss:$0 sm:$0xff]  ;;  %v137_v20 = vld [vmem:[#allocation2 + $0x3] ss:$0 sm:$0xff] }
  0xa9   :  { %v118_v13 = vxor.u32 2147483648, %v117_v12  ;;  %v128_v17 = vxor.u32 2147483648, %v127_v15  ;;  %v138_v22 = vxor.u32 2147483648, %v137_v20  ;;  %v147_v25 = vld [vmem:[#allocation2 + $0x4] ss:$0 sm:$0xff] }
  0xaa   :  { %v148_v27 = vxor.u32 2147483648, %v147_v25  ;;  %v157_v30 = vld [vmem:[#allocation2 + $0x5] ss:$0 sm:$0xff]  ;;  %v167_v38 = vld [vmem:[#allocation2 + $0x6] ss:$0 sm:$0xff] }
  0xab   :  { %v122_v14 = vmul.f32 %v118_v13, %v101_v11  ;;  %v158_v33 = vxor.u32 2147483648, %v157_v30  ;;  %v168_v40 = vxor.u32 2147483648, %v167_v38  ;;  %v177_v47 = vld [vmem:[#allocation2 + $0x7] ss:$0 sm:$0xff] }
  0xac   :  { %v178_v50 = vxor.u32 2147483648, %v177_v47  ;;  %v79_v47 = vadd.s32 16, %v532_v3 }
  0xad   :  { %123 = vadd.xlane.f32.xlu0 %v122_v14 }
  0xae   :  { %vm85_vm10 = vcmp.ge.s32.totalorder %v79_v47, %v530_v2  ;;  %vm114_vm13 = vcmp.eq.s32.totalorder %v530_v2, %v79_v47 }
 0x13a   :  { %v124_v16 = vpop.xlane.xlu0 %123 }
 0x13b   :  { %v125_v18 = vsel %vm121_vm6, %v124_v16, %v101_v11  ;;  %vm247_vm6 = vcmp.eq.s32.totalorder %v530_v2, 12 }
 0x13c   :  { %v132_v19 = vmul.f32 %v128_v17, %v125_v18 }
 0x13e   :  { %133 = vadd.xlane.f32.xlu1 %v132_v19 }
 0x1cb   :  { %v134_v21 = vpop.xlane.xlu1 %133 }
 0x1cc   :  { %v135_v23 = vsel %vm131_vm7, %v134_v21, %v125_v18  ;;  %vm261_vm7 = vcmp.eq.s32.totalorder %v530_v2, 13 }
 0x1cd   :  { %v142_v24 = vmul.f32 %v138_v22, %v135_v23 }
 0x1cf   :  { %143 = vadd.xlane.f32.xlu1 %v142_v24 }
 0x25c   :  { %v144_v26 = vpop.xlane.xlu1 %143 }
 0x25d   :  { %v145_v28 = vsel %vm141_vm8, %v144_v26, %v135_v23  ;;  %vm80_vm8 = vcmp.eq.s32.totalorder %v79_v47, %v530_v2 }
 0x25e   :  { %v152_v29 = vmul.f32 %v148_v27, %v145_v28 }
 0x260   :  { %153 = vadd.xlane.f32.xlu0 %v152_v29 }
 0x2ed   :  { %v154_v32 = vpop.xlane.xlu0 %153 }
 0x2ee   :  { %v155_v34 = vsel %vm151_vm9, %v154_v32, %v145_v28  ;;  %vm275_vm9 = vcmp.eq.s32.totalorder %v530_v2, 14 }
 0x2ef   :  { %v162_v35 = vmul.f32 %v158_v33, %v155_v34 }
 0x2f1   :  { %163 = vadd.xlane.f32.xlu1 %v162_v35 }
 0x2f5   :  { %67 = vadd.xlane.f32.xlu1 %v66_v37 }
 0x37e   :  { %v164_v39 = vpop.xlane.xlu1 %163 }
 0x37f   :  { %v165_v41 = vsel %vm161_vm11, %v164_v39, %v155_v34  ;;  %vm86_vm11 = vmand %vm85_vm10, %vm44_vm1  ;;  %vm303_vm1 = vcmp.eq.s32.totalorder %v530_v2, 16 }
 0x380   :  { %v172_v42 = vmul.f32 %v168_v40, %v165_v41 }
 0x382   :  { %173 = vadd.xlane.f32.xlu0 %v172_v42  ;;  %v560_v43 = vpop.xlane.xlu1 %67 }
 0x383   :  { %511 = vrcp.f32 %v560_v43 }
 0x38d   :  { %v566_v45 = vpop.eup %511 }
 0x38e   :  { %v73_v46 = vmul.f32 %v566_v45, %v71_v44 }
 0x390   :  { %74 = vst [vmem:[#allocation2 + $0x8] sm:$0xff] %v73_v46 }
 0x397   :  { %v187_v48 = vld [vmem:[#allocation2 + $0x8] ss:$0 sm:$0xff]  ;;  %v201_v59 = vld [vmem:[#allocation2 + $0x9] ss:$0 sm:$0xff]  ;;  %v215_v6 = vld [vmem:[#allocation2 + $0xa] ss:$0 sm:$0xff] }
 0x398   :  { %v188_v51 = vxor.u32 2147483648, %v187_v48  ;;  %v202_v62 = vxor.u32 2147483648, %v201_v59  ;;  %v216_v10 = vxor.u32 2147483648, %v215_v6  ;;  %v229_v15 = vld [vmem:[#allocation2 + $0xb] ss:$0 sm:$0xff] }
 0x399   :  { %v230_v18 = vxor.u32 2147483648, %v229_v15  ;;  %v243_v23 = vld [vmem:[#allocation2 + $0xc] ss:$0 sm:$0xff]  ;;  %v257_v31 = vld [vmem:[#allocation2 + $0xd] ss:$0 sm:$0xff] }
 0x39a   :  { %v196_v56 = vmul.f32 %v188_v51, %v108_v54  ;;  %v244_v26 = vxor.u32 2147483648, %v243_v23  ;;  %v258_v34 = vxor.u32 2147483648, %v257_v31  ;;  %v271_v39 = vld [vmem:[#allocation2 + $0xe] ss:$0 sm:$0xff] }
 0x39b   :  { %v272_v42 = vxor.u32 2147483648, %v271_v39 }
 0x40f   :  { %v174_v49 = vpop.xlane.xlu0 %173 }
 0x410   :  { %v175_v52 = vsel %vm171_vm14, %v174_v49, %v165_v41  ;;  %vm321_vm14 = vcmp.eq.s32.totalorder %v530_v2, 17 }
 0x411   :  { %v182_v55 = vmul.f32 %v178_v50, %v175_v52 }
 0x413   :  { %183 = vadd.xlane.f32.xlu0 %v182_v55  ;;  %v285_v55 = vld [vmem:[#allocation2 + $0xf] ss:$0 sm:$0xff] }
 0x417   :  { %197 = vadd.xlane.f32.xlu0 %v196_v56 }
 0x4a0   :  { %v184_v57 = vpop.xlane.xlu0 %183 }
 0x4a1   :  { %v185_v58 = vsel %vm181_vm0, %v184_v57, %v175_v52  ;;  %v286_v57 = vxor.u32 2147483648, %v285_v55  ;;  %vm357_vm0 = vcmp.eq.s32.totalorder %v530_v2, 19 }
 0x4a2   :  { %v192_v60 = vmul.f32 %v188_v51, %v185_v58  ;;  %v37_v51 = vld [vmem:[%s620_s0 + $0x10] sm:$0xff] }
 0x4a4   :  { %v198_v61 = vpop.xlane.xlu0 %197  ;;  %193 = vadd.xlane.f32.xlu1 %v192_v60 }
 0x4a5   :  { %v199_v63 = vsel %vm191_vm2, %v198_v61, %v108_v54  ;;  %v82_v54 = vsel %vm80_vm8, %v37_v51, 0.0 }
 0x4a6   :  { %v210_v0 = vmul.f32 %v202_v62, %v199_v63 }
 0x4a8   :  { %211 = vadd.xlane.f32.xlu0 %v210_v0 }
 0x531   :  { %v194_v1 = vpop.xlane.xlu1 %193 }
 0x532   :  { %v195_v4 = vsel %vm191_vm2, %v194_v1, %v185_v58  ;;  %vm375_vm2 = vcmp.eq.s32.totalorder %v530_v2, 20 }
 0x533   :  { %v206_v8 = vmul.f32 %v202_v62, %v195_v4  ;;  %v87_v62 = vsel %vm86_vm11, %v37_v51, 0.0 }
 0x535   :  { %v212_v9 = vpop.xlane.xlu0 %211  ;;  %207 = vadd.xlane.f32.xlu1 %v206_v8 }
 0x536   :  { %v213_v11 = vsel %vm205_vm3, %v212_v9, %v199_v63 }
 0x537   :  { %v224_v12 = vmul.f32 %v216_v10, %v213_v11 }
 0x539   :  { %225 = vadd.xlane.f32.xlu0 %v224_v12 }
 0x5c2   :  { %v208_v13 = vpop.xlane.xlu1 %207 }
 0x5c3   :  { %v209_v14 = vsel %vm205_vm3, %v208_v13, %v195_v4  ;;  %v115_v13 = vsel %vm114_vm13, -1.0, %v516_v53  ;;  %vm393_vm3 = vcmp.eq.s32.totalorder %v530_v2, 21 }
 0x5c4   :  { %v220_v16 = vmul.f32 %v216_v10, %v209_v14 }
 0x5c6   :  { %v226_v17 = vpop.xlane.xlu0 %225  ;;  %221 = vadd.xlane.f32.xlu1 %v220_v16 }
 0x5c7   :  { %v227_v19 = vsel %vm219_vm4, %v226_v17, %v213_v11 }
 0x5c8   :  { %v238_v20 = vmul.f32 %v230_v18, %v227_v19 }
 0x5ca   :  { %239 = vadd.xlane.f32.xlu0 %v238_v20 }
 0x653   :  { %v222_v21 = vpop.xlane.xlu1 %221 }
 0x654   :  { %v223_v22 = vsel %vm219_vm4, %v222_v21, %v209_v14  ;;  %vm411_vm4 = vcmp.eq.s32.totalorder %v530_v2, 22 }
 0x655   :  { %v234_v24 = vmul.f32 %v230_v18, %v223_v22 }
 0x657   :  { %v240_v25 = vpop.xlane.xlu0 %239  ;;  %235 = vadd.xlane.f32.xlu1 %v234_v24 }
 0x658   :  { %v241_v27 = vsel %vm233_vm5, %v240_v25, %v227_v19 }
 0x659   :  { %v252_v28 = vmul.f32 %v244_v26, %v241_v27 }
 0x65b   :  { %253 = vadd.xlane.f32.xlu0 %v252_v28 }
 0x6e4   :  { %v236_v29 = vpop.xlane.xlu1 %235 }
 0x6e5   :  { %v237_v30 = vsel %vm233_vm5, %v236_v29, %v223_v22  ;;  %vm429_vm5 = vcmp.eq.s32.totalorder %v530_v2, 23 }
 0x6e6   :  { %v248_v32 = vmul.f32 %v244_v26, %v237_v30 }
 0x6e8   :  { %v254_v33 = vpop.xlane.xlu0 %253  ;;  %249 = vadd.xlane.f32.xlu1 %v248_v32 }
 0x6e9   :  { %v255_v35 = vsel %vm247_vm6, %v254_v33, %v241_v27 }
 0x6ea   :  { %v266_v36 = vmul.f32 %v258_v34, %v255_v35 }
 0x6ec   :  { %267 = vadd.xlane.f32.xlu0 %v266_v36 }
 0x775   :  { %v250_v37 = vpop.xlane.xlu1 %249 }
 0x776   :  { %v251_v38 = vsel %vm247_vm6, %v250_v37, %v237_v30  ;;  %vm449_vm6 = vweird.f32 %v560_v43 }
 0x777   :  { %v262_v40 = vmul.f32 %v258_v34, %v251_v38 }
 0x779   :  { %v268_v41 = vpop.xlane.xlu0 %267  ;;  %263 = vadd.xlane.f32.xlu1 %v262_v40 }
 0x77a   :  { %v269_v44 = vsel %vm261_vm7, %v268_v41, %v255_v35 }
 0x77b   :  { %v280_v46 = vmul.f32 %v272_v42, %v269_v44 }
 0x77d   :  { %281 = vadd.xlane.f32.xlu0 %v280_v46 }
 0x806   :  { %v264_v48 = vpop.xlane.xlu1 %263 }
 0x807   :  { %v265_v49 = vsel %vm261_vm7, %v264_v48, %v251_v38  ;;  %vm444_vm7 = vweird.f32 %v536_v5 }
 0x808   :  { %v276_v50 = vmul.f32 %v272_v42, %v265_v49 }
 0x80a   :  { %v282_v52 = vpop.xlane.xlu0 %281  ;;  %277 = vadd.xlane.f32.xlu1 %v276_v50 }
 0x80b   :  { %v283_v56 = vsel %vm275_vm9, %v282_v52, %v269_v44 }
 0x80c   :  { %v294_v58 = vmul.f32 %v286_v57, %v283_v56 }
 0x80e   :  { %83 = vadd.xlane.f32.xlu1 %v82_v54 }
 0x812   :  { %295 = vadd.xlane.f32.xlu1 %v294_v58 }
 0x897   :  { %v278_v3 = vpop.xlane.xlu1 %277 }
 0x898   :  { %v279_v59 = vsel %vm275_vm9, %v278_v3, %v265_v49 }
 0x899   :  { %v290_v60 = vmul.f32 %v286_v57, %v279_v59 }
 0x89b   :  { %291 = vadd.xlane.f32.xlu0 %v290_v60  ;;  %v585_v61 = vpop.xlane.xlu1 %83 }
 0x89c   :  { %513 = vrcp.f32 %v585_v61  ;;  %vm455_vm8 = vweird.f32 %v585_v61 }
 0x89f   :  { %v296_v1 = vpop.xlane.xlu1 %295 }
 0x8a0   :  { %v297_v8 = vsel %vm289_vm12, %v296_v1, %v283_v56 }
 0x8a6   :  { %v591_v63 = vpop.eup %513 }
 0x8a7   :  { %v89_v0 = vmul.f32 %v591_v63, %v87_v62 }
 0x8a9   :  { %90 = vst [vmem:[#allocation2 + $0x10] sm:$0xff] %v89_v0 }
 0x8b0   :  { %v299_v4 = vld [vmem:[#allocation2 + $0x10] ss:$0 sm:$0xff]  ;;  %v317_v15 = vld [vmem:[#allocation2 + $0x11] ss:$0 sm:$0xff]  ;;  %v335_v53 = vld [vmem:[#allocation2 + $0x12] ss:$0 sm:$0xff] }
 0x8b1   :  { %v300_v6 = vxor.u32 2147483648, %v299_v4  ;;  %v318_v17 = vxor.u32 2147483648, %v317_v15  ;;  %v336_v27 = vxor.u32 2147483648, %v335_v53  ;;  %v353_v36 = vld [vmem:[#allocation2 + $0x13] ss:$0 sm:$0xff] }
 0x8b2   :  { %v354_v38 = vxor.u32 2147483648, %v353_v36  ;;  %v371_v49 = vld [vmem:[#allocation2 + $0x14] ss:$0 sm:$0xff]  ;;  %v389_v60 = vld [vmem:[#allocation2 + $0x15] ss:$0 sm:$0xff] }
 0x8b3   :  { %v308_v9 = vmul.f32 %v300_v6, %v297_v8  ;;  %v312_v14 = vmul.f32 %v300_v6, %v115_v13  ;;  %v372_v51 = vxor.u32 2147483648, %v371_v49  ;;  %v390_v0 = vxor.u32 2147483648, %v389_v60 }
 0x8b5   :  { %309 = vadd.xlane.f32.xlu1 %v308_v9 }
 0x928   :  { %v292_v10 = vpop.xlane.xlu0 %291 }
 0x929   :  { %v293_v11 = vsel %vm289_vm12, %v292_v10, %v279_v59 }
 0x92a   :  { %v304_v12 = vmul.f32 %v300_v6, %v293_v11 }
 0x92c   :  { %305 = vadd.xlane.f32.xlu0 %v304_v12 }
 0x930   :  { %313 = vadd.xlane.f32.xlu0 %v312_v14 }
 0x942   :  { %v310_v16 = vpop.xlane.xlu1 %309 }
 0x943   :  { %v311_v18 = vsel %vm303_vm1, %v310_v16, %v297_v8 }
 0x944   :  { %v326_v19 = vmul.f32 %v318_v17, %v311_v18 }
 0x946   :  { %327 = vadd.xlane.f32.xlu0 %v326_v19 }
 0x9b9   :  { %v306_v20 = vpop.xlane.xlu0 %305 }
 0x9ba   :  { %v307_v21 = vsel %vm303_vm1, %v306_v20, %v293_v11 }
 0x9bb   :  { %v322_v22 = vmul.f32 %v318_v17, %v307_v21 }
 0x9bd   :  { %v314_v23 = vpop.xlane.xlu0 %313  ;;  %323 = vadd.xlane.f32.xlu1 %v322_v22 }
 0x9be   :  { %v315_v24 = vsel %vm303_vm1, %v314_v23, %v115_v13  ;;  %v407_v13 = vld [vmem:[#allocation2 + $0x16] ss:$0 sm:$0xff] }
 0x9bf   :  { %v330_v25 = vmul.f32 %v318_v17, %v315_v24  ;;  %v408_v15 = vxor.u32 2147483648, %v407_v13 }
 0x9c1   :  { %331 = vadd.xlane.f32.xlu1 %v330_v25 }
 0x9d3   :  { %v328_v26 = vpop.xlane.xlu0 %327 }
 0x9d4   :  { %v329_v28 = vsel %vm321_vm14, %v328_v26, %v311_v18 }
 0x9d5   :  { %v344_v29 = vmul.f32 %v336_v27, %v329_v28 }
 0x9d7   :  { %345 = vadd.xlane.f32.xlu1 %v344_v29 }
 0xa4a   :  { %v324_v30 = vpop.xlane.xlu1 %323 }
 0xa4b   :  { %v325_v31 = vsel %vm321_vm14, %v324_v30, %v307_v21 }
 0xa4c   :  { %v340_v32 = vmul.f32 %v336_v27, %v325_v31 }
 0xa4e   :  { %341 = vadd.xlane.f32.xlu0 %v340_v32  ;;  %v332_v33 = vpop.xlane.xlu1 %331 }
 0xa4f   :  { %v333_v34 = vsel %vm321_vm14, %v332_v33, %v315_v24  ;;  %v425_v24 = vld [vmem:[#allocation2 + $0x17] ss:$0 sm:$0xff] }
 0xa50   :  { %v348_v35 = vmul.f32 %v336_v27, %v333_v34  ;;  %v426_v53 = vxor.u32 2147483648, %v425_v24 }
 0xa52   :  { %349 = vadd.xlane.f32.xlu0 %v348_v35 }
 0xa64   :  { %v346_v37 = vpop.xlane.xlu1 %345 }
 0xa65   :  { %v347_v39 = vsel %vm339_vm15, %v346_v37, %v329_v28 }
 0xa66   :  { %v362_v40 = vmul.f32 %v354_v38, %v347_v39 }
 0xa68   :  { %363 = vadd.xlane.f32.xlu0 %v362_v40 }
 0xadb   :  { %v342_v41 = vpop.xlane.xlu0 %341 }
 0xadc   :  { %v343_v42 = vsel %vm339_vm15, %v342_v41, %v325_v31 }
 0xadd   :  { %v358_v44 = vmul.f32 %v354_v38, %v343_v42 }
 0xadf   :  { %359 = vadd.xlane.f32.xlu1 %v358_v44  ;;  %v350_v46 = vpop.xlane.xlu0 %349 }
 0xae0   :  { %v351_v47 = vsel %vm339_vm15, %v350_v46, %v333_v34 }
 0xae1   :  { %v366_v48 = vmul.f32 %v354_v38, %v351_v47 }
 0xae3   :  { %367 = vadd.xlane.f32.xlu1 %v366_v48 }
 0xaf5   :  { %v364_v50 = vpop.xlane.xlu0 %363 }
 0xaf6   :  { %v365_v52 = vsel %vm357_vm0, %v364_v50, %v347_v39 }
 0xaf7   :  { %v380_v54 = vmul.f32 %v372_v51, %v365_v52 }
 0xaf9   :  { %381 = vadd.xlane.f32.xlu1 %v380_v54 }
 0xb6c   :  { %v360_v55 = vpop.xlane.xlu1 %359 }
 0xb6d   :  { %v361_v56 = vsel %vm357_vm0, %v360_v55, %v343_v42 }
 0xb6e   :  { %v376_v57 = vmul.f32 %v372_v51, %v361_v56 }
 0xb70   :  { %377 = vadd.xlane.f32.xlu0 %v376_v57  ;;  %v368_v58 = vpop.xlane.xlu1 %367 }
 0xb71   :  { %v369_v3 = vsel %vm357_vm0, %v368_v58, %v351_v47 }
 0xb72   :  { %v384_v59 = vmul.f32 %v372_v51, %v369_v3 }
 0xb74   :  { %385 = vadd.xlane.f32.xlu0 %v384_v59 }
 0xb86   :  { %v382_v62 = vpop.xlane.xlu1 %381 }
 0xb87   :  { %v383_v1 = vsel %vm375_vm2, %v382_v62, %v365_v52 }
 0xb88   :  { %v398_v4 = vmul.f32 %v390_v0, %v383_v1 }
 0xb8a   :  { %399 = vadd.xlane.f32.xlu0 %v398_v4 }
 0xbfd   :  { %v378_v6 = vpop.xlane.xlu0 %377 }
 0xbfe   :  { %v379_v8 = vsel %vm375_vm2, %v378_v6, %v361_v56 }
 0xbff   :  { %v394_v9 = vmul.f32 %v390_v0, %v379_v8 }
 0xc01   :  { %395 = vadd.xlane.f32.xlu1 %v394_v9  ;;  %v386_v10 = vpop.xlane.xlu0 %385 }
 0xc02   :  { %v387_v11 = vsel %vm375_vm2, %v386_v10, %v369_v3 }
 0xc03   :  { %v402_v12 = vmul.f32 %v390_v0, %v387_v11 }
 0xc05   :  { %403 = vadd.xlane.f32.xlu1 %v402_v12 }
 0xc17   :  { %v400_v14 = vpop.xlane.xlu0 %399 }
 0xc18   :  { %v401_v16 = vsel %vm393_vm3, %v400_v14, %v383_v1 }
 0xc19   :  { %v416_v17 = vmul.f32 %v408_v15, %v401_v16 }
 0xc1b   :  { %417 = vadd.xlane.f32.xlu1 %v416_v17 }
 0xc8e   :  { %v396_v18 = vpop.xlane.xlu1 %395 }
 0xc8f   :  { %v397_v19 = vsel %vm393_vm3, %v396_v18, %v379_v8 }
 0xc90   :  { %v412_v20 = vmul.f32 %v408_v15, %v397_v19 }
 0xc92   :  { %413 = vadd.xlane.f32.xlu0 %v412_v20  ;;  %v404_v21 = vpop.xlane.xlu1 %403 }
 0xc93   :  { %v405_v22 = vsel %vm393_vm3, %v404_v21, %v387_v11 }
 0xc94   :  { %v420_v23 = vmul.f32 %v408_v15, %v405_v22 }
 0xc96   :  { %421 = vadd.xlane.f32.xlu0 %v420_v23 }
 0xca8   :  { %v418_v25 = vpop.xlane.xlu1 %417 }
 0xca9   :  { %v419_v26 = vsel %vm411_vm4, %v418_v25, %v401_v16 }
 0xcaa   :  { %v434_v27 = vmul.f32 %v426_v53, %v419_v26 }
 0xcac   :  { %435 = vadd.xlane.f32.xlu0 %v434_v27 }
 0xd1f   :  { %v414_v28 = vpop.xlane.xlu0 %413 }
 0xd20   :  { %v415_v29 = vsel %vm411_vm4, %v414_v28, %v397_v19 }
 0xd21   :  { %v430_v30 = vmul.f32 %v426_v53, %v415_v29 }
 0xd23   :  { %431 = vadd.xlane.f32.xlu1 %v430_v30  ;;  %v422_v31 = vpop.xlane.xlu0 %421 }
 0xd24   :  { %v423_v32 = vsel %vm411_vm4, %v422_v31, %v405_v22 }
 0xd25   :  { %v438_v33 = vmul.f32 %v426_v53, %v423_v32 }
 0xd27   :  { %439 = vadd.xlane.f32.xlu1 %v438_v33 }
 0xd39   :  { %v436_v34 = vpop.xlane.xlu0 %435 }
 0xd3a   :  { %v437_v35 = vsel %vm429_vm5, %v436_v34, %v419_v26 }
 0xd3b   :  { %v448_v36 = vmul.f32 %v566_v45, %v437_v35 }
 0xd3d   :  { %v450_v37 = vsel %vm449_vm6, %v437_v35, %v448_v36 }
 0xd3e   :  { %493 = vst [vmem:[%s621_s1 + $0x8] sm:$0xff] %v450_v37 }
 0xdb0   :  { %v432_v38 = vpop.xlane.xlu1 %431 }
 0xdb1   :  { %v433_v39 = vsel %vm429_vm5, %v432_v38, %v415_v29 }
 0xdb2   :  { %v443_v40 = vmul.f32 %v544_v7, %v433_v39 }
 0xdb4   :  { %v445_v41 = vsel %vm444_vm7, %v433_v39, %v443_v40  ;;  %v440_v42 = vpop.xlane.xlu1 %439 }
 0xdb5   :  { %491 = vst [vmem:[%s621_s1] sm:$0xff] %v445_v41  ;;  %v441_v2 = vsel %vm429_vm5, %v440_v42, %v423_v32 }
 0xdb6   :  { %v454_v43 = vmul.f32 %v591_v63, %v441_v2 }
 0xdb8   :  { %v456_v45 = vsel %vm455_vm8, %v441_v2, %v454_v43 }
 0xdb9   :  { %495 = vst [vmem:[%s621_s1 + $0x10] sm:$0xff] %v456_v45 }

// kernel: neg.1
= control target key start
LH: loop header
LB: loop body
LE: loop exit
PB: predicated region body
PF: predicated region fallthrough
CT: control target
= control target key end

     0   :  { %s24_s0 = inlined_call_operand.vmem [shape: f32[24], index: 0, kind: input, shape index: {}]   ;;  %s25_s1 = inlined_call_operand.vmem [shape: f32[24], index: 1, kind: output, shape index: {}]  }
   0x1   :  { %v2_v0 = vld [vmem:[%s24_s0] sm:$0x1] }
   0x2   :  { %v5_v1 = vxor.u32 2147483648, %v2_v0 }
   0x4   :  { %7 = vst [vmem:[%s25_s1] sm:$0x1] %v5_v1 }

// kernel: custom-call.9
= control target key start
LH: loop header
LB: loop body
LE: loop exit
PB: predicated region body
PF: predicated region fallthrough
CT: control target
= control target key end

     0   :  { %v42_v0 = vlaneseq  ;;  %v514_v10 = vmov -1.0   ;;  %v515_v48 = vmov 0.0   ;;  %s695_s0 = inlined_call_operand.vmem [shape: f32[1,24,24], index: 0, kind: input, shape index: {}]   ;;  %s696_s1 = inlined_call_operand.vmem [shape: f32[1,24,24], index: 1, kind: output, shape index: {}]  }
   0x1   :  { %v37_v3 = vld [vmem:[%s695_s0 + $0x10] sm:$0xff]  ;;  %v35_v37 = vld [vmem:[%s695_s0 + $0x8] sm:$0xff] }
   0x2   :  { %v526_v1 = vand.u32 127, %v42_v0  ;;  %v528_v2 = vshrl.u32 %v42_v0, 7 }
   0x4   :  { %vm44_vm0 = vcmp.lt.s32.totalorder %v526_v1, 24  ;;  %v79_v4 = vadd.s32 16, %v528_v2  ;;  %vm113_vm4 = vcmp.eq.s32.totalorder %v526_v1, 23  ;;  %vm121_vm6 = vcmp.eq.s32.totalorder %v526_v1, 22 }
   0x5   :  { %v114_v11 = vsel %vm113_vm4, 1.0, %v514_v10  ;;  %vm131_vm7 = vcmp.eq.s32.totalorder %v526_v1, 21  ;;  %vm141_vm8 = vcmp.eq.s32.totalorder %v526_v1, 20  ;;  %vm151_vm9 = vcmp.eq.s32.totalorder %v526_v1, 19 }
   0x6   :  { %vm80_vm1 = vcmp.eq.s32.totalorder %v79_v4, %v526_v1  ;;  %vm85_vm2 = vcmp.le.s32.totalorder %v79_v4, %v526_v1  ;;  %vm110_vm5 = vcmp.eq.s32.totalorder %v526_v1, %v79_v4  ;;  %v63_v32 = vadd.s32 8, %v528_v2 }
   0x7   :  { %v82_v5 = vsel %vm80_vm1, %v37_v3, 0.0  ;;  %vm86_vm3 = vmand %vm85_vm2, %vm44_vm0  ;;  %v115_v12 = vsel %vm110_vm5, %v114_v11, 0.0  ;;  %vm161_vm11 = vcmp.eq.s32.totalorder %v526_v1, 18  ;;  %vm171_vm15 = vcmp.eq.s32.totalorder %v526_v1, 17 }
   0x8   :  { %v87_v6 = vsel %vm86_vm3, %v37_v3, 0.0  ;;  %83 = vadd.xlane.f32.xlu0 %v82_v5  ;;  %vm64_vm10 = vcmp.eq.s32.totalorder %v63_v32, %v526_v1  ;;  %vm69_vm12 = vcmp.le.s32.totalorder %v63_v32, %v526_v1  ;;  %vm103_vm14 = vcmp.eq.s32.totalorder %v526_v1, %v63_v32 }
   0x9   :  { %v66_v38 = vsel %vm64_vm10, %v35_v37, 0.0  ;;  %vm70_vm13 = vmand %vm69_vm12, %vm44_vm0  ;;  %v104_v49 = vsel %vm103_vm14, -1.0, %v515_v48  ;;  %vm191_vm1 = vcmp.eq.s32.totalorder %v526_v1, 15  ;;  %vm181_vm2 = vcmp.eq.s32.totalorder %v526_v1, 16 }
   0xa   :  { %v71_v45 = vsel %vm70_vm13, %v35_v37, 0.0  ;;  %vm205_vm3 = vcmp.eq.s32.totalorder %v526_v1, 14  ;;  %vm219_vm4 = vcmp.eq.s32.totalorder %v526_v1, 13  ;;  %vm233_vm5 = vcmp.eq.s32.totalorder %v526_v1, 12 }
   0xb   :  { %vm96_vm12 = vcmp.eq.s32.totalorder %v526_v1, %v528_v2  ;;  %vm303_vm13 = vcmp.eq.s32.totalorder %v526_v1, 7  ;;  %vm321_vm14 = vcmp.eq.s32.totalorder %v526_v1, 6 }
  0x95   :  { %v539_v7 = vpop.xlane.xlu0 %83 }
  0x96   :  { %508 = vrcp.f32 %v539_v7 }
  0xa0   :  { %v542_v8 = vpop.eup %508 }
  0xa1   :  { %v89_v9 = vmul.f32 %v542_v8, %v87_v6 }
  0xa3   :  { %90 = vst [vmem:[#allocation2 + $0x10] sm:$0xff] %v89_v9 }
  0xaa   :  { %v117_v13 = vld [vmem:[#allocation2 + $0x16] ss:$0 sm:$0xff]  ;;  %v127_v16 = vld [vmem:[#allocation2 + $0x15] ss:$0 sm:$0xff]  ;;  %v137_v21 = vld [vmem:[#allocation2 + $0x14] ss:$0 sm:$0xff] }
  0xab   :  { %v118_v14 = vxor.u32 2147483648, %v117_v13  ;;  %v128_v18 = vxor.u32 2147483648, %v127_v16  ;;  %v138_v23 = vxor.u32 2147483648, %v137_v21  ;;  %v147_v26 = vld [vmem:[#allocation2 + $0x13] ss:$0 sm:$0xff] }
  0xac   :  { %v148_v28 = vxor.u32 2147483648, %v147_v26  ;;  %v157_v31 = vld [vmem:[#allocation2 + $0x12] ss:$0 sm:$0xff]  ;;  %v167_v39 = vld [vmem:[#allocation2 + $0x11] ss:$0 sm:$0xff] }
  0xad   :  { %v122_v15 = vmul.f32 %v118_v14, %v115_v12  ;;  %v158_v34 = vxor.u32 2147483648, %v157_v31  ;;  %v168_v41 = vxor.u32 2147483648, %v167_v39  ;;  %v177_v53 = vld [vmem:[#allocation2 + $0x10] ss:$0 sm:$0xff] }
  0xae   :  { %v178_v55 = vxor.u32 2147483648, %v177_v53 }
  0xaf   :  { %123 = vadd.xlane.f32.xlu0 %v122_v15 }
 0x13c   :  { %v124_v17 = vpop.xlane.xlu0 %123 }
 0x13d   :  { %v125_v19 = vsel %vm121_vm6, %v124_v17, %v115_v12  ;;  %vm247_vm6 = vcmp.eq.s32.totalorder %v526_v1, 11 }
 0x13e   :  { %v132_v20 = vmul.f32 %v128_v18, %v125_v19 }
 0x140   :  { %133 = vadd.xlane.f32.xlu1 %v132_v20 }
 0x1cd   :  { %v134_v22 = vpop.xlane.xlu1 %133 }
 0x1ce   :  { %v135_v24 = vsel %vm131_vm7, %v134_v22, %v125_v19  ;;  %vm261_vm7 = vcmp.eq.s32.totalorder %v526_v1, 10 }
 0x1cf   :  { %v142_v25 = vmul.f32 %v138_v23, %v135_v24 }
 0x1d1   :  { %143 = vadd.xlane.f32.xlu1 %v142_v25 }
 0x25e   :  { %v144_v27 = vpop.xlane.xlu1 %143 }
 0x25f   :  { %v145_v29 = vsel %vm141_vm8, %v144_v27, %v135_v24  ;;  %vm48_vm8 = vcmp.eq.s32.totalorder %v528_v2, %v526_v1 }
 0x260   :  { %v152_v30 = vmul.f32 %v148_v28, %v145_v29 }
 0x262   :  { %153 = vadd.xlane.f32.xlu0 %v152_v30 }
 0x2ef   :  { %v154_v33 = vpop.xlane.xlu0 %153 }
 0x2f0   :  { %v155_v35 = vsel %vm151_vm9, %v154_v33, %v145_v29  ;;  %vm53_vm9 = vcmp.le.s32.totalorder %v528_v2, %v526_v1 }
 0x2f1   :  { %v162_v36 = vmul.f32 %v158_v34, %v155_v35  ;;  %vm54_vm10 = vmand %vm53_vm9, %vm44_vm0  ;;  %vm289_vm0 = vcmp.eq.s32.totalorder %v526_v1, 8 }
 0x2f3   :  { %163 = vadd.xlane.f32.xlu1 %v162_v36 }
 0x2f7   :  { %67 = vadd.xlane.f32.xlu1 %v66_v38 }
 0x380   :  { %v164_v40 = vpop.xlane.xlu1 %163 }
 0x381   :  { %v165_v42 = vsel %vm161_vm11, %v164_v40, %v155_v35  ;;  %vm275_vm11 = vcmp.eq.s32.totalorder %v526_v1, 9 }
 0x382   :  { %v172_v43 = vmul.f32 %v168_v41, %v165_v42 }
 0x384   :  { %173 = vadd.xlane.f32.xlu0 %v172_v43  ;;  %v557_v44 = vpop.xlane.xlu1 %67  ;;  %v33_v43 = vld [vmem:[%s695_s0] sm:$0xff] }
 0x385   :  { %510 = vrcp.f32 %v557_v44  ;;  %v55_v53 = vsel %vm54_vm10, %v33_v43, 0.0 }
 0x38f   :  { %v563_v46 = vpop.eup %510 }
 0x390   :  { %v73_v47 = vmul.f32 %v563_v46, %v71_v45  ;;  %v50_v45 = vsel %vm48_vm8, %v33_v43, 0.0  ;;  %vm454_vm8 = vweird.f32 %v539_v7 }
 0x392   :  { %74 = vst [vmem:[#allocation2 + $0x8] sm:$0xff] %v73_v47 }
 0x399   :  { %v187_v50 = vld [vmem:[#allocation2 + $0xf] ss:$0 sm:$0xff]  ;;  %v201_v58 = vld [vmem:[#allocation2 + $0xe] ss:$0 sm:$0xff]  ;;  %v215_v4 = vld [vmem:[#allocation2 + $0xd] ss:$0 sm:$0xff] }
 0x39a   :  { %v188_v51 = vxor.u32 2147483648, %v187_v50  ;;  %v202_v59 = vxor.u32 2147483648, %v201_v58  ;;  %v216_v6 = vxor.u32 2147483648, %v215_v4  ;;  %v229_v14 = vld [vmem:[#allocation2 + $0xc] ss:$0 sm:$0xff] }
 0x39b   :  { %v230_v16 = vxor.u32 2147483648, %v229_v14  ;;  %v243_v22 = vld [vmem:[#allocation2 + $0xb] ss:$0 sm:$0xff]  ;;  %v257_v30 = vld [vmem:[#allocation2 + $0xa] ss:$0 sm:$0xff] }
 0x39c   :  { %v192_v52 = vmul.f32 %v188_v51, %v104_v49  ;;  %v244_v24 = vxor.u32 2147483648, %v243_v22  ;;  %v258_v32 = vxor.u32 2147483648, %v257_v30  ;;  %v271_v38 = vld [vmem:[#allocation2 + $0x9] ss:$0 sm:$0xff]  ;;  %v285_v58 = vld [vmem:[#allocation2 + $0x8] ss:$0 sm:$0xff] }
 0x39d   :  { %v272_v40 = vxor.u32 2147483648, %v271_v38 }
 0x39e   :  { %193 = vadd.xlane.f32.xlu1 %v192_v52 }
 0x411   :  { %v174_v54 = vpop.xlane.xlu0 %173 }
 0x412   :  { %v175_v56 = vsel %vm171_vm15, %v174_v54, %v165_v42  ;;  %vm339_vm15 = vcmp.eq.s32.totalorder %v526_v1, 5 }
 0x413   :  { %v182_v57 = vmul.f32 %v178_v55, %v175_v56 }
 0x415   :  { %183 = vadd.xlane.f32.xlu0 %v182_v57 }
 0x42b   :  { %v194_v60 = vpop.xlane.xlu1 %193 }
 0x42c   :  { %v195_v61 = vsel %vm191_vm1, %v194_v60, %v104_v49 }
 0x42d   :  { %v206_v62 = vmul.f32 %v202_v59, %v195_v61 }
 0x42f   :  { %207 = vadd.xlane.f32.xlu1 %v206_v62  ;;  %v286_v62 = vxor.u32 2147483648, %v285_v58 }
 0x4a2   :  { %v184_v63 = vpop.xlane.xlu0 %183 }
 0x4a3   :  { %v185_v0 = vsel %vm181_vm2, %v184_v63, %v175_v56  ;;  %vm375_vm2 = vcmp.eq.s32.totalorder %v526_v1, 3 }
 0x4a4   :  { %v196_v3 = vmul.f32 %v188_v51, %v185_v0 }
 0x4a6   :  { %197 = vadd.xlane.f32.xlu0 %v196_v3 }
 0x4bc   :  { %v208_v5 = vpop.xlane.xlu1 %207 }
 0x4bd   :  { %v209_v9 = vsel %vm205_vm3, %v208_v5, %v195_v61 }
 0x4be   :  { %v220_v10 = vmul.f32 %v216_v6, %v209_v9 }
 0x4c0   :  { %221 = vadd.xlane.f32.xlu1 %v220_v10 }
 0x533   :  { %v198_v11 = vpop.xlane.xlu0 %197 }
 0x534   :  { %v199_v12 = vsel %vm191_vm1, %v198_v11, %v185_v0  ;;  %v97_v0 = vsel %vm96_vm12, -1.0, %v515_v48  ;;  %vm357_vm1 = vcmp.eq.s32.totalorder %v526_v1, 4 }
 0x535   :  { %v210_v13 = vmul.f32 %v202_v59, %v199_v12 }
 0x537   :  { %211 = vadd.xlane.f32.xlu0 %v210_v13 }
 0x54d   :  { %v222_v15 = vpop.xlane.xlu1 %221 }
 0x54e   :  { %v223_v17 = vsel %vm219_vm4, %v222_v15, %v209_v9 }
 0x54f   :  { %v234_v18 = vmul.f32 %v230_v16, %v223_v17 }
 0x551   :  { %235 = vadd.xlane.f32.xlu1 %v234_v18 }
 0x5c4   :  { %v212_v19 = vpop.xlane.xlu0 %211 }
 0x5c5   :  { %v213_v20 = vsel %vm205_vm3, %v212_v19, %v199_v12  ;;  %vm393_vm3 = vcmp.eq.s32.totalorder %v526_v1, 2 }
 0x5c6   :  { %v224_v21 = vmul.f32 %v216_v6, %v213_v20 }
 0x5c8   :  { %225 = vadd.xlane.f32.xlu0 %v224_v21 }
 0x5de   :  { %v236_v23 = vpop.xlane.xlu1 %235 }
 0x5df   :  { %v237_v25 = vsel %vm233_vm5, %v236_v23, %v223_v17 }
 0x5e0   :  { %v248_v26 = vmul.f32 %v244_v24, %v237_v25 }
 0x5e2   :  { %249 = vadd.xlane.f32.xlu1 %v248_v26 }
 0x655   :  { %v226_v27 = vpop.xlane.xlu0 %225 }
 0x656   :  { %v227_v28 = vsel %vm219_vm4, %v226_v27, %v213_v20  ;;  %vm411_vm4 = vcmp.eq.s32.totalorder %v526_v1, 1 }
 0x657   :  { %v238_v29 = vmul.f32 %v230_v16, %v227_v28 }
 0x659   :  { %239 = vadd.xlane.f32.xlu0 %v238_v29 }
 0x66f   :  { %v250_v31 = vpop.xlane.xlu1 %249 }
 0x670   :  { %v251_v33 = vsel %vm247_vm6, %v250_v31, %v237_v25 }
 0x671   :  { %v262_v34 = vmul.f32 %v258_v32, %v251_v33 }
 0x673   :  { %263 = vadd.xlane.f32.xlu1 %v262_v34 }
 0x6e6   :  { %v240_v35 = vpop.xlane.xlu0 %239 }
 0x6e7   :  { %v241_v36 = vsel %vm233_vm5, %v240_v35, %v227_v28  ;;  %vm428_vm5 = vcmp.eq.s32.totalorder %v526_v1, 0 }
 0x6e8   :  { %v252_v37 = vmul.f32 %v244_v24, %v241_v36 }
 0x6ea   :  { %253 = vadd.xlane.f32.xlu0 %v252_v37 }
 0x700   :  { %v264_v39 = vpop.xlane.xlu1 %263 }
 0x701   :  { %v265_v41 = vsel %vm261_vm7, %v264_v39, %v251_v33 }
 0x702   :  { %v276_v42 = vmul.f32 %v272_v40, %v265_v41 }
 0x704   :  { %277 = vadd.xlane.f32.xlu1 %v276_v42 }
 0x708   :  { %51 = vadd.xlane.f32.xlu1 %v50_v45 }
 0x777   :  { %v254_v47 = vpop.xlane.xlu0 %253 }
 0x778   :  { %v255_v49 = vsel %vm247_vm6, %v254_v47, %v241_v36 }
 0x779   :  { %v266_v50 = vmul.f32 %v258_v32, %v255_v49 }
 0x77b   :  { %267 = vadd.xlane.f32.xlu0 %v266_v50 }
 0x791   :  { %v278_v51 = vpop.xlane.xlu1 %277 }
 0x792   :  { %v279_v61 = vsel %vm275_vm11, %v278_v51, %v265_v41 }
 0x793   :  { %v290_v3 = vmul.f32 %v286_v62, %v279_v61 }
 0x795   :  { %v603_v52 = vpop.xlane.xlu1 %51 }
 0x796   :  { %512 = vrcp.f32 %v603_v52  ;;  %vm443_vm6 = vweird.f32 %v603_v52 }
 0x7a0   :  { %v610_v54 = vpop.eup %512 }
 0x7a1   :  { %v57_v55 = vmul.f32 %v610_v54, %v55_v53 }
 0x7a3   :  { %58 = vst [vmem:[#allocation2] sm:$0xff] %v57_v55 }
 0x7aa   :  { %v299_v59 = vld [vmem:[#allocation2 + $0x7] ss:$0 sm:$0xff]  ;;  %v317_v2 = vld [vmem:[#allocation2 + $0x6] ss:$0 sm:$0xff]  ;;  %v335_v21 = vld [vmem:[#allocation2 + $0x5] ss:$0 sm:$0xff] }
 0x7ab   :  { %v300_v63 = vxor.u32 2147483648, %v299_v59  ;;  %v318_v13 = vxor.u32 2147483648, %v317_v2  ;;  %v336_v24 = vxor.u32 2147483648, %v335_v21  ;;  %v353_v32 = vld [vmem:[#allocation2 + $0x4] ss:$0 sm:$0xff] }
 0x7ac   :  { %v354_v35 = vxor.u32 2147483648, %v353_v32  ;;  %v371_v43 = vld [vmem:[#allocation2 + $0x3] ss:$0 sm:$0xff]  ;;  %v389_v59 = vld [vmem:[#allocation2 + $0x2] ss:$0 sm:$0xff] }
 0x7ad   :  { %v304_v4 = vmul.f32 %v300_v63, %v97_v0  ;;  %v407_v2 = vld [vmem:[#allocation2 + $0x1] ss:$0 sm:$0xff] }
 0x808   :  { %v268_v56 = vpop.xlane.xlu0 %267 }
 0x809   :  { %v269_v57 = vsel %vm261_vm7, %v268_v56, %v255_v49  ;;  %v372_v49 = vxor.u32 2147483648, %v371_v43  ;;  %vm448_vm7 = vweird.f32 %v557_v44 }
 0x80a   :  { %v280_v60 = vmul.f32 %v272_v40, %v269_v57 }
 0x80c   :  { %281 = vadd.xlane.f32.xlu0 %v280_v60 }
 0x810   :  { %291 = vadd.xlane.f32.xlu0 %v290_v3 }
 0x814   :  { %305 = vadd.xlane.f32.xlu0 %v304_v4 }
 0x899   :  { %v282_v5 = vpop.xlane.xlu0 %281 }
 0x89a   :  { %v283_v6 = vsel %vm275_vm11, %v282_v5, %v269_v57 }
 0x89b   :  { %v294_v9 = vmul.f32 %v286_v62, %v283_v6  ;;  %v390_v62 = vxor.u32 2147483648, %v389_v59 }
 0x89d   :  { %v292_v10 = vpop.xlane.xlu0 %291  ;;  %295 = vadd.xlane.f32.xlu1 %v294_v9 }
 0x89e   :  { %v293_v11 = vsel %vm289_vm0, %v292_v10, %v279_v61 }
 0x89f   :  { %v308_v12 = vmul.f32 %v300_v63, %v293_v11 }
 0x8a1   :  { %309 = vadd.xlane.f32.xlu1 %v308_v12  ;;  %v306_v48 = vpop.xlane.xlu0 %305  ;;  %v408_v12 = vxor.u32 2147483648, %v407_v2 }
 0x8a2   :  { %v307_v14 = vsel %vm303_vm13, %v306_v48, %v97_v0 }
 0x8a3   :  { %v322_v15 = vmul.f32 %v318_v13, %v307_v14 }
 0x8a5   :  { %323 = vadd.xlane.f32.xlu1 %v322_v15 }
 0x92a   :  { %v296_v16 = vpop.xlane.xlu1 %295 }
 0x92b   :  { %v297_v17 = vsel %vm289_vm0, %v296_v16, %v283_v6 }
 0x92c   :  { %v312_v18 = vmul.f32 %v300_v63, %v297_v17 }
 0x92e   :  { %313 = vadd.xlane.f32.xlu0 %v312_v18  ;;  %v310_v19 = vpop.xlane.xlu1 %309 }
 0x92f   :  { %v311_v20 = vsel %vm303_vm13, %v310_v19, %v293_v11  ;;  %v424_v19 = vld [vmem:[#allocation2] ss:$0 sm:$0xff] }
 0x930   :  { %v326_v22 = vmul.f32 %v318_v13, %v311_v20 }
 0x932   :  { %327 = vadd.xlane.f32.xlu0 %v326_v22  ;;  %v324_v23 = vpop.xlane.xlu1 %323  ;;  %v425_v22 = vxor.u32 2147483648, %v424_v19 }
 0x933   :  { %v325_v25 = vsel %vm321_vm14, %v324_v23, %v307_v14 }
 0x934   :  { %v340_v26 = vmul.f32 %v336_v24, %v325_v25 }
 0x936   :  { %341 = vadd.xlane.f32.xlu0 %v340_v26 }
 0x9bb   :  { %v314_v27 = vpop.xlane.xlu0 %313 }
 0x9bc   :  { %v315_v28 = vsel %vm303_vm13, %v314_v27, %v297_v17 }
 0x9bd   :  { %v330_v29 = vmul.f32 %v318_v13, %v315_v28 }
 0x9bf   :  { %331 = vadd.xlane.f32.xlu1 %v330_v29  ;;  %v328_v30 = vpop.xlane.xlu0 %327 }
 0x9c0   :  { %v329_v31 = vsel %vm321_vm14, %v328_v30, %v311_v20 }
 0x9c1   :  { %v344_v33 = vmul.f32 %v336_v24, %v329_v31 }
 0x9c3   :  { %345 = vadd.xlane.f32.xlu1 %v344_v33  ;;  %v342_v34 = vpop.xlane.xlu0 %341 }
 0x9c4   :  { %v343_v36 = vsel %vm339_vm15, %v342_v34, %v325_v25 }
 0x9c5   :  { %v358_v37 = vmul.f32 %v354_v35, %v343_v36 }
 0x9c7   :  { %359 = vadd.xlane.f32.xlu1 %v358_v37 }
 0xa4c   :  { %v332_v38 = vpop.xlane.xlu1 %331 }
 0xa4d   :  { %v333_v39 = vsel %vm321_vm14, %v332_v38, %v315_v28 }
 0xa4e   :  { %v348_v40 = vmul.f32 %v336_v24, %v333_v39 }
 0xa50   :  { %349 = vadd.xlane.f32.xlu0 %v348_v40  ;;  %v346_v41 = vpop.xlane.xlu1 %345 }
 0xa51   :  { %v347_v42 = vsel %vm339_vm15, %v346_v41, %v329_v31 }
 0xa52   :  { %v362_v45 = vmul.f32 %v354_v35, %v347_v42 }
 0xa54   :  { %363 = vadd.xlane.f32.xlu0 %v362_v45  ;;  %v360_v47 = vpop.xlane.xlu1 %359 }
 0xa55   :  { %v361_v50 = vsel %vm357_vm1, %v360_v47, %v343_v36 }
 0xa56   :  { %v376_v51 = vmul.f32 %v372_v49, %v361_v50 }
 0xa58   :  { %377 = vadd.xlane.f32.xlu0 %v376_v51 }
 0xadd   :  { %v350_v53 = vpop.xlane.xlu0 %349 }
 0xade   :  { %v351_v55 = vsel %vm339_vm15, %v350_v53, %v333_v39 }
 0xadf   :  { %v366_v56 = vmul.f32 %v354_v35, %v351_v55 }
 0xae1   :  { %367 = vadd.xlane.f32.xlu1 %v366_v56  ;;  %v364_v57 = vpop.xlane.xlu0 %363 }
 0xae2   :  { %v365_v58 = vsel %vm357_vm1, %v364_v57, %v347_v42 }
 0xae3   :  { %v380_v60 = vmul.f32 %v372_v49, %v365_v58 }
 0xae5   :  { %381 = vadd.xlane.f32.xlu1 %v380_v60  ;;  %v378_v61 = vpop.xlane.xlu0 %377 }
 0xae6   :  { %v379_v63 = vsel %vm375_vm2, %v378_v61, %v361_v50 }
 0xae7   :  { %v394_v0 = vmul.f32 %v390_v62, %v379_v63 }
 0xae9   :  { %395 = vadd.xlane.f32.xlu1 %v394_v0 }
 0xb6e   :  { %v368_v3 = vpop.xlane.xlu1 %367 }
 0xb6f   :  { %v369_v4 = vsel %vm357_vm1, %v368_v3, %v351_v55 }
 0xb70   :  { %v384_v5 = vmul.f32 %v372_v49, %v369_v4 }
 0xb72   :  { %385 = vadd.xlane.f32.xlu0 %v384_v5  ;;  %v382_v6 = vpop.xlane.xlu1 %381 }
 0xb73   :  { %v383_v9 = vsel %vm375_vm2, %v382_v6, %v365_v58 }
 0xb74   :  { %v398_v10 = vmul.f32 %v390_v62, %v383_v9 }
 0xb76   :  { %399 = vadd.xlane.f32.xlu0 %v398_v10  ;;  %v396_v11 = vpop.xlane.xlu1 %395 }
 0xb77   :  { %v397_v13 = vsel %vm393_vm3, %v396_v11, %v379_v63 }
 0xb78   :  { %v412_v48 = vmul.f32 %v408_v12, %v397_v13 }
 0xb7a   :  { %413 = vadd.xlane.f32.xlu0 %v412_v48 }
 0xbff   :  { %v386_v14 = vpop.xlane.xlu0 %385 }
 0xc00   :  { %v387_v15 = vsel %vm375_vm2, %v386_v14, %v369_v4 }
 0xc01   :  { %v402_v16 = vmul.f32 %v390_v62, %v387_v15 }
 0xc03   :  { %403 = vadd.xlane.f32.xlu1 %v402_v16  ;;  %v400_v17 = vpop.xlane.xlu0 %399 }
 0xc04   :  { %v401_v18 = vsel %vm393_vm3, %v400_v17, %v383_v9 }
 0xc05   :  { %v416_v20 = vmul.f32 %v408_v12, %v401_v18 }
 0xc07   :  { %417 = vadd.xlane.f32.xlu1 %v416_v20  ;;  %v414_v21 = vpop.xlane.xlu0 %413 }
 0xc08   :  { %v415_v23 = vsel %vm411_vm4, %v414_v21, %v397_v13 }
 0xc09   :  { %v429_v24 = vmul.f32 %v425_v22, %v415_v23 }
 0xc0b   :  { %430 = vadd.xlane.f32.xlu1 %v429_v24 }
 0xc90   :  { %v404_v25 = vpop.xlane.xlu1 %403 }
 0xc91   :  { %v405_v26 = vsel %vm393_vm3, %v404_v25, %v387_v15 }
 0xc92   :  { %v420_v27 = vmul.f32 %v408_v12, %v405_v26 }
 0xc94   :  { %421 = vadd.xlane.f32.xlu0 %v420_v27  ;;  %v418_v28 = vpop.xlane.xlu1 %417 }
 0xc95   :  { %v419_v29 = vsel %vm411_vm4, %v418_v28, %v401_v18 }
 0xc96   :  { %v433_v30 = vmul.f32 %v425_v22, %v419_v29 }
 0xc98   :  { %434 = vadd.xlane.f32.xlu0 %v433_v30  ;;  %v431_v31 = vpop.xlane.xlu1 %430 }
 0xc99   :  { %v432_v32 = vsel %vm428_vm5, %v431_v31, %v415_v23 }
 0xc9a   :  { %v442_v33 = vmul.f32 %v610_v54, %v432_v32 }
 0xc9c   :  { %v444_v34 = vsel %vm443_vm6, %v432_v32, %v442_v33 }
 0xc9d   :  { %490 = vst [vmem:[%s696_s1] sm:$0xff] %v444_v34 }
 0xd21   :  { %v422_v35 = vpop.xlane.xlu0 %421 }
 0xd22   :  { %v423_v36 = vsel %vm411_vm4, %v422_v35, %v405_v26 }
 0xd23   :  { %v437_v37 = vmul.f32 %v425_v22, %v423_v36 }
 0xd25   :  { %438 = vadd.xlane.f32.xlu1 %v437_v37  ;;  %v435_v38 = vpop.xlane.xlu0 %434 }
 0xd26   :  { %v436_v39 = vsel %vm428_vm5, %v435_v38, %v419_v29 }
 0xd27   :  { %v447_v40 = vmul.f32 %v563_v46, %v436_v39 }
 0xd29   :  { %v449_v52 = vsel %vm448_vm7, %v436_v39, %v447_v40 }
 0xd2a   :  { %492 = vst [vmem:[%s696_s1 + $0x8] sm:$0xff] %v449_v52 }
 0xdb2   :  { %v439_v54 = vpop.xlane.xlu1 %438 }
 0xdb3   :  { %v440_v41 = vsel %vm428_vm5, %v439_v54, %v423_v36 }
 0xdb4   :  { %v453_v42 = vmul.f32 %v542_v8, %v440_v41 }
 0xdb6   :  { %v455_v43 = vsel %vm454_vm8, %v440_v41, %v453_v42 }
 0xdb7   :  { %494 = vst [vmem:[%s696_s1 + $0x10] sm:$0xff] %v455_v43 }

// kernel: matgl_loss_forward.1
= control target key start
LH: loop header
LB: loop body
LE: loop exit
PB: predicated region body
PF: predicated region fallthrough
CT: control target
= control target key end

     0   :  { %v24_v0 = vlaneseq  ;;  %s551_s0 = inlined_call_operand.vmem [shape: f32[128,128], index: 0, kind: input, shape index: {}]   ;;  %s552_s1 = inlined_call_operand.vmem [shape: f32[128,128], index: 1, kind: output, shape index: {}]  }
   0x1   :  { %v8_v1 = vld [vmem:[%s551_s0] sm:$0xff]  ;;  %v9_v2 = vld [vmem:[%s551_s0 + $0x8] sm:$0xff]  ;;  %v10_v4 = vld [vmem:[%s551_s0 + $0x10] sm:$0xff] }
   0x2   :  { %v204_v3 = vshrl.u32 %v24_v0, 7  ;;  %v209_v5 = vsub.f32 0.0, %v8_v1  ;;  %v211_v6 = vsub.f32 0.0, %v9_v2  ;;  %v11_v7 = vld [vmem:[%s551_s0 + $0x18] sm:$0xff]  ;;  %v219_v9 = vand.u32 127, %v24_v0  ;;  %v12_v11 = vld [vmem:[%s551_s0 + $0x20] sm:$0xff] }
   0x3   :  { %v221_v10 = vsub.f32 0.0, %v10_v4  ;;  %v229_v13 = vsub.f32 0.0, %v11_v7  ;;  %v13_v16 = vld [vmem:[%s551_s0 + $0x28] sm:$0xff]  ;;  %v243_v18 = vsub.f32 0.0, %v12_v11  ;;  %v14_v20 = vld [vmem:[%s551_s0 + $0x30] sm:$0xff]  ;;  %v15_v26 = vld [vmem:[%s551_s0 + $0x38] sm:$0xff] }
   0x4   :  { %v217_v8 = vadd.s32 8, %v204_v3  ;;  %v227_v12 = vadd.s32 16, %v204_v3  ;;  %v75_v14 = vand.u32 2147483647, %v209_v5  ;;  %v76_v15 = vand.u32 2147483647, %v211_v6 }
   0x5   :  { %v237_v17 = vadd.s32 24, %v204_v3  ;;  %vm43_vm0 = vcmp.eq.s32.totalorder %v204_v3, %v219_v9  ;;  %v77_v19 = vand.u32 2147483647, %v221_v10  ;;  %v250_v21 = vadd.s32 32, %v204_v3  ;;  %v16_v31 = vld [vmem:[%s551_s0 + $0x40] sm:$0xff]  ;;  %v17_v37 = vld [vmem:[%s551_s0 + $0x48] sm:$0xff] }
   0x6   :  { %vm44_vm1 = vcmp.eq.s32.totalorder %v217_v8, %v219_v9  ;;  %vm45_vm2 = vcmp.eq.s32.totalorder %v227_v12, %v219_v9  ;;  %v254_v22 = vsub.f32 0.0, %v13_v16  ;;  %v78_v23 = vand.u32 2147483647, %v229_v13  ;;  %v18_v43 = vld [vmem:[%s551_s0 + $0x50] sm:$0xff]  ;;  %v19_v49 = vld [vmem:[%s551_s0 + $0x58] sm:$0xff]  ;;  %v20_v55 = vld [vmem:[%s551_s0 + $0x60] sm:$0xff] }
   0x7   :  { %v91_v24 = vsel %vm43_vm0, %v75_v14, 0.0  ;;  %v92_v25 = vsel %vm44_vm1, %v76_v15, 0.0  ;;  %v267_v27 = vadd.s32 40, %v204_v3  ;;  %vm46_vm3 = vcmp.eq.s32.totalorder %v237_v17, %v219_v9  ;;  %v21_v61 = vld [vmem:[%s551_s0 + $0x68] sm:$0xff]  ;;  %v22_v4 = vld [vmem:[%s551_s0 + $0x70] sm:$0xff] }
   0x8   :  { %v271_v28 = vsub.f32 0.0, %v14_v20  ;;  %v79_v29 = vand.u32 2147483647, %v243_v18  ;;  %v93_v30 = vsel %vm45_vm2, %v77_v19, 0.0  ;;  %v281_v32 = vadd.s32 48, %v204_v3  ;;  %v23_v19 = vld [vmem:[%s551_s0 + $0x78] sm:$0xff] }
   0x9   :  { %vm47_vm4 = vcmp.eq.s32.totalorder %v250_v21, %v219_v9  ;;  %v107_v33 = vadd.f32 %v92_v25, %v91_v24  ;;  %v285_v34 = vsub.f32 0.0, %v15_v26  ;;  %v80_v35 = vand.u32 2147483647, %v254_v22 }
   0xa   :  { %v94_v36 = vsel %vm46_vm3, %v78_v23, 0.0  ;;  %v295_v38 = vadd.s32 56, %v204_v3  ;;  %vm48_vm5 = vcmp.eq.s32.totalorder %v267_v27, %v219_v9  ;;  %v299_v40 = vsub.f32 0.0, %v16_v31 }
   0xb   :  { %v108_v39 = vadd.f32 %v107_v33, %v93_v30  ;;  %v81_v41 = vand.u32 2147483647, %v271_v28  ;;  %v95_v42 = vsel %vm47_vm4, %v79_v29, 0.0  ;;  %v309_v44 = vadd.s32 64, %v204_v3 }
   0xc   :  { %vm49_vm6 = vcmp.eq.s32.totalorder %v281_v32, %v219_v9  ;;  %v313_v46 = vsub.f32 0.0, %v17_v37  ;;  %v82_v47 = vand.u32 2147483647, %v285_v34  ;;  %v96_v48 = vsel %vm48_vm5, %v80_v35, 0.0 }
   0xd   :  { %v109_v45 = vadd.f32 %v108_v39, %v94_v36  ;;  %v323_v50 = vadd.s32 72, %v204_v3  ;;  %vm50_vm7 = vcmp.eq.s32.totalorder %v295_v38, %v219_v9  ;;  %v327_v52 = vsub.f32 0.0, %v18_v43 }
   0xe   :  { %v83_v53 = vand.u32 2147483647, %v299_v40  ;;  %v97_v54 = vsel %vm49_vm6, %v81_v41, 0.0  ;;  %v337_v56 = vadd.s32 80, %v204_v3  ;;  %vm51_vm8 = vcmp.eq.s32.totalorder %v309_v44, %v219_v9 }
   0xf   :  { %v110_v51 = vadd.f32 %v109_v45, %v95_v42  ;;  %v341_v58 = vsub.f32 0.0, %v19_v49  ;;  %v84_v59 = vand.u32 2147483647, %v313_v46  ;;  %v98_v60 = vsel %vm50_vm7, %v82_v47, 0.0 }
  0x10   :  { %v351_v62 = vadd.s32 88, %v204_v3  ;;  %vm52_vm9 = vcmp.eq.s32.totalorder %v323_v50, %v219_v9  ;;  %v355_v0 = vsub.f32 0.0, %v20_v55  ;;  %v85_v1 = vand.u32 2147483647, %v327_v52 }
  0x11   :  { %v111_v57 = vadd.f32 %v110_v51, %v96_v48  ;;  %v99_v2 = vsel %vm51_vm8, %v83_v53, 0.0  ;;  %v365_v7 = vadd.s32 96, %v204_v3  ;;  %vm53_vm10 = vcmp.eq.s32.totalorder %v337_v56, %v219_v9 }
  0x12   :  { %v369_v14 = vsub.f32 0.0, %v21_v61  ;;  %v86_v15 = vand.u32 2147483647, %v341_v58  ;;  %v100_v16 = vsel %vm52_vm9, %v84_v59, 0.0  ;;  %v379_v20 = vadd.s32 104, %v204_v3 }
  0x13   :  { %v112_v63 = vadd.f32 %v111_v57, %v97_v54  ;;  %vm54_vm11 = vcmp.eq.s32.totalorder %v351_v62, %v219_v9  ;;  %v383_v24 = vsub.f32 0.0, %v22_v4  ;;  %v87_v25 = vand.u32 2147483647, %v355_v0 }
  0x14   :  { %v101_v26 = vsel %vm53_vm10, %v85_v1, 0.0  ;;  %v390_v29 = vadd.s32 112, %v204_v3  ;;  %vm55_vm12 = vcmp.eq.s32.totalorder %v365_v7, %v219_v9  ;;  %v394_v31 = vsub.f32 0.0, %v23_v19 }
  0x15   :  { %v113_v11 = vadd.f32 %v112_v63, %v98_v60  ;;  %v88_v33 = vand.u32 2147483647, %v369_v14  ;;  %v102_v35 = vsel %vm54_vm11, %v86_v15, 0.0  ;;  %v401_v36 = vadd.s32 120, %v204_v3 }
  0x16   :  { %vm56_vm13 = vcmp.eq.s32.totalorder %v379_v20, %v219_v9  ;;  %v89_v39 = vand.u32 2147483647, %v383_v24  ;;  %v103_v41 = vsel %vm55_vm12, %v87_v25, 0.0  ;;  %vm57_vm14 = vcmp.eq.s32.totalorder %v390_v29, %v219_v9 }
  0x17   :  { %v114_v23 = vadd.f32 %v113_v11, %v99_v2  ;;  %v90_v43 = vand.u32 2147483647, %v394_v31  ;;  %v104_v45 = vsel %vm56_vm13, %v88_v33, 0.0  ;;  %vm58_vm15 = vcmp.eq.s32.totalorder %v401_v36, %v219_v9 }
  0x18   :  { %v105_v48 = vsel %vm57_vm14, %v89_v39, 0.0 }
  0x19   :  { %v115_v30 = vadd.f32 %v114_v23, %v100_v16  ;;  %v106_v51 = vsel %vm58_vm15, %v90_v43, 0.0 }
  0x1b   :  { %v116_v37 = vadd.f32 %v115_v30, %v101_v26 }
  0x1d   :  { %v117_v42 = vadd.f32 %v116_v37, %v102_v35 }
  0x1f   :  { %v118_v47 = vadd.f32 %v117_v42, %v103_v41 }
  0x21   :  { %v119_v49 = vadd.f32 %v118_v47, %v104_v45 }
  0x23   :  { %v120_v53 = vadd.f32 %v119_v49, %v105_v48 }
  0x25   :  { %v121_v54 = vadd.f32 %v120_v53, %v106_v51 }
  0x27   :  { %122 = vadd.xlane.f32.xlu0 %v121_v54 }
  0xb4   :  { %v123_v55 = vpop.xlane.xlu0 %122 }
  0xb5   :  { %v124_v57 = vrot.slane %v123_v55, 4 }
  0xb7   :  { %v125_v59 = vadd.f32 %v124_v57, %v123_v55 }
  0xb9   :  { %v126_v60 = vrot.slane %v125_v59, 2 }
  0xbb   :  { %v127_v61 = vadd.f32 %v126_v60, %v125_v59 }
  0xbd   :  { %v128_v63 = vrot.slane %v127_v61, 1 }
  0xbf   :  { %v129_v1 = vadd.f32 %v128_v63, %v127_v61 }
  0xc1   :  { %186 = vpush %v129_v1 }
  0xf2   :  { %s187_s0 = spop %186 }
  0xf3   :  { %s131_s9 = smul.f32 0.041666668, %s187_s0 }
  0xf5   :  { %s132_s10 = smul.f32 0.1, %s131_s9 }
  0xf7   :  { %v133_v2 = vstv %s132_s10 }
  0xf8   :  { %v134_v4 = vadd.f32 %v133_v2, %v209_v5  ;;  %v135_v11 = vadd.f32 %v133_v2, %v211_v6  ;;  %v136_v15 = vadd.f32 %v133_v2, %v221_v10  ;;  %v137_v16 = vadd.f32 %v133_v2, %v229_v13 }
  0xf9   :  { %v138_v19 = vadd.f32 %v133_v2, %v243_v18  ;;  %v139_v23 = vadd.f32 %v133_v2, %v254_v22  ;;  %v140_v25 = vadd.f32 %v133_v2, %v271_v28  ;;  %v141_v26 = vadd.f32 %v133_v2, %v285_v34 }
  0xfa   :  { %v142_v30 = vadd.f32 %v133_v2, %v299_v40  ;;  %v143_v33 = vadd.f32 %v133_v2, %v313_v46  ;;  %v144_v35 = vadd.f32 %v133_v2, %v327_v52  ;;  %v145_v37 = vadd.f32 %v133_v2, %v341_v58 }
  0xfb   :  { %v146_v39 = vadd.f32 %v133_v2, %v355_v0  ;;  %v147_v41 = vadd.f32 %v133_v2, %v369_v14  ;;  %v148_v42 = vadd.f32 %v133_v2, %v383_v24  ;;  %v149_v43 = vadd.f32 %v133_v2, %v394_v31 }
  0xfc   :  { %v150_v45 = vsel %vm43_vm0, %v134_v4, %v209_v5  ;;  %v151_v47 = vsel %vm44_vm1, %v135_v11, %v211_v6  ;;  %v152_v48 = vsel %vm45_vm2, %v136_v15, %v221_v10  ;;  %v153_v49 = vsel %vm46_vm3, %v137_v16, %v229_v13 }
  0xfd   :  { %v154_v3 = vsel %vm47_vm4, %v138_v19, %v243_v18  ;;  %v155_v5 = vsel %vm48_vm5, %v139_v23, %v254_v22  ;;  %v156_v6 = vsel %vm49_vm6, %v140_v25, %v271_v28  ;;  %v157_v8 = vsel %vm50_vm7, %v141_v26, %v285_v34  ;;  %166 = vst [vmem:[%s552_s1] sm:$0xff] %v150_v45 }
  0xfe   :  { %167 = vst [vmem:[%s552_s1 + $0x8] sm:$0xff] %v151_v47  ;;  %168 = vst [vmem:[%s552_s1 + $0x10] sm:$0xff] %v152_v48  ;;  %v158_v10 = vsel %vm51_vm8, %v142_v30, %v299_v40  ;;  %v159_v12 = vsel %vm52_vm9, %v143_v33, %v313_v46  ;;  %v160_v13 = vsel %vm53_vm10, %v144_v35, %v327_v52 }
  0xff   :  { %169 = vst [vmem:[%s552_s1 + $0x18] sm:$0xff] %v153_v49  ;;  %v161_v17 = vsel %vm54_vm11, %v145_v37, %v341_v58  ;;  %170 = vst [vmem:[%s552_s1 + $0x20] sm:$0xff] %v154_v3  ;;  %v162_v18 = vsel %vm55_vm12, %v146_v39, %v355_v0  ;;  %v163_v21 = vsel %vm56_vm13, %v147_v41, %v369_v14 }
 0x100   :  { %171 = vst [vmem:[%s552_s1 + $0x28] sm:$0xff] %v155_v5  ;;  %172 = vst [vmem:[%s552_s1 + $0x30] sm:$0xff] %v156_v6  ;;  %v164_v22 = vsel %vm57_vm14, %v148_v42, %v383_v24  ;;  %v165_v27 = vsel %vm58_vm15, %v149_v43, %v394_v31 }
 0x101   :  { %173 = vst [vmem:[%s552_s1 + $0x38] sm:$0xff] %v157_v8  ;;  %174 = vst [vmem:[%s552_s1 + $0x40] sm:$0xff] %v158_v10 }
 0x102   :  { %175 = vst [vmem:[%s552_s1 + $0x48] sm:$0xff] %v159_v12  ;;  %176 = vst [vmem:[%s552_s1 + $0x50] sm:$0xff] %v160_v13 }
 0x103   :  { %177 = vst [vmem:[%s552_s1 + $0x58] sm:$0xff] %v161_v17  ;;  %178 = vst [vmem:[%s552_s1 + $0x60] sm:$0xff] %v162_v18 }
 0x104   :  { %179 = vst [vmem:[%s552_s1 + $0x68] sm:$0xff] %v163_v21  ;;  %180 = vst [vmem:[%s552_s1 + $0x70] sm:$0xff] %v164_v22 }
 0x105   :  { %181 = vst [vmem:[%s552_s1 + $0x78] sm:$0xff] %v165_v27 }

</bundles_post_ra>
